<compile_context>
chip_gen: v6e
topology: v6e:2x2x1
jax: 0.10.0
libtpu: 0.0.40
codegen_flags: <defaults>
</compile_context>

<pallas_src>
import functools

import numpy as np
import jax
import jax.numpy as jnp
from jax import lax
from jax.experimental import pallas as pl
from jax.experimental.pallas import tpu as pltpu


# ------------- module hyper-parameters (small, consistent with MBConv) -------------
BATCH = 2
IN_CHANS = 32
OUT_CHANS = 32                              # MBConv residual needs in_chans == out_chans
EXPAND_RATIO = 4
HIDDEN = int(IN_CHANS * EXPAND_RATIO)       # 128 -> exactly one 128-lane vreg width
H = W = 8
BN_EPS = 1e-5

_SQRT_2_OVER_PI = 0.7978845608028654


def _gelu(x):
    # tanh-approximate GELU; identical formula used in kernel and reference.
    return 0.5 * x * (1.0 + jnp.tanh(_SQRT_2_OVER_PI * (x + 0.044715 * (x * x * x))))


# ---------------------------------- Pallas kernel ----------------------------------
def mbconv_kernel(x_ref, w1_ref, b1_ref, w2_ref, b2_ref, w3_ref, b3_ref,
                  o_ref, pad_ref, *, bsz, hh, ww, cin, chid, cout):
    # x_ref: (B, H, W, Cin) NHWC. Flatten batch+spatial for the pointwise convs.
    xf = x_ref[...].reshape(bsz * hh * ww, cin)                      # (B*H*W, Cin)

    # conv1 (1x1, BN folded) + GELU — one MXU matmul for the whole batch.
    h1 = jnp.dot(xf, w1_ref[...], preferred_element_type=jnp.float32) + b1_ref[...]
    h1 = _gelu(h1)                                                   # (B*H*W, HIDDEN)

    # depthwise 3x3 (BN folded): zero-padded VMEM scratch + 9 shifted multiply-adds.
    pad_ref[...] = jnp.zeros_like(pad_ref)
    pad_ref[:, 1:hh + 1, 1:ww + 1, :] = h1.reshape(bsz, hh, ww, chid)
    acc = jnp.broadcast_to(b2_ref[...].reshape(1, 1, 1, chid), (bsz, hh, ww, chid))
    for dy in range(3):                        # static 3x3 tap loop (fully unrolled)
        for dx in range(3):
            tap_w = w2_ref[dy, dx].reshape(1, 1, 1, chid)            # per-channel weight
            acc = acc + pad_ref[:, dy:dy + hh, dx:dx + ww, :] * tap_w
    h2 = _gelu(acc).reshape(bsz * hh * ww, chid)

    # conv3 (1x1, BN folded) — second MXU matmul.
    h3 = jnp.dot(h2, w3_ref[...], preferred_element_type=jnp.float32) + b3_ref[...]

    # drop_path == Identity at inference; residual add + final activation.
    o_ref[...] = _gelu(h3 + xf).reshape(bsz, hh, ww, cout)


def mbconv_forward(x_nchw, fp):
    """x_nchw: (B, Cin, H, W) f32. fp: folded conv+BN parameters (see fold_bn)."""
    b, cin, hh, ww = x_nchw.shape
    chid = fp["w1"].shape[1]
    cout = fp["w3"].shape[1]
    x_nhwc = jnp.transpose(x_nchw, (0, 2, 3, 1))   # channels-last: C on the lane axis

    kernel = functools.partial(
        mbconv_kernel, bsz=b, hh=hh, ww=ww, cin=cin, chid=chid, cout=cout)
    vmem = lambda: pl.BlockSpec(memory_space=pltpu.MemorySpace.VMEM)

    out_nhwc = pl.pallas_call(
        kernel,
        out_shape=jax.ShapeDtypeStruct((b, hh, ww, cout), jnp.float32),
        in_specs=[vmem() for _ in range(7)],
        out_specs=vmem(),
        scratch_shapes=[pltpu.VMEM((b, hh + 2, ww + 2, chid), jnp.float32)],
    )(x_nhwc, fp["w1"], fp["b1"], fp["w2"], fp["b2"], fp["w3"], fp["b3"])
    return jnp.transpose(out_nhwc, (0, 3, 1, 2))


# -------------------- parameter construction (deterministic, synthetic) --------------------
def build_raw_params(key):
    ks = jax.random.split(key, 15)
    n = lambda k, shape, s: jax.random.normal(k, shape, jnp.float32) * s
    u = lambda k, shape: jax.random.uniform(k, shape, jnp.float32, 0.5, 1.5)
    return {
        # Conv2dBN ('c': conv bias=False, 'bn': BatchNorm2d) x3, PyTorch layouts.
        "conv1_w": n(ks[0], (HIDDEN, IN_CHANS, 1, 1), 0.15),
        "bn1_g": 1.0 + n(ks[1], (HIDDEN,), 0.1),
        "bn1_b": n(ks[2], (HIDDEN,), 0.1),
        "bn1_m": n(ks[3], (HIDDEN,), 0.1),
        "bn1_v": u(ks[4], (HIDDEN,)),
        "conv2_w": n(ks[5], (HIDDEN, 1, 3, 3), 0.3),          # depthwise 3x3
        "bn2_g": 1.0 + n(ks[6], (HIDDEN,), 0.1),
        "bn2_b": n(ks[7], (HIDDEN,), 0.1),
        "bn2_m": n(ks[8], (HIDDEN,), 0.1),
        "bn2_v": u(ks[9], (HIDDEN,)),
        "conv3_w": n(ks[10], (OUT_CHANS, HIDDEN, 1, 1), 0.08),
        "bn3_g": 1.0 + n(ks[11], (OUT_CHANS,), 0.1),
        "bn3_b": n(ks[12], (OUT_CHANS,), 0.1),
        "bn3_m": n(ks[13], (OUT_CHANS,), 0.1),
        "bn3_v": u(ks[14], (OUT_CHANS,)),
    }


def fold_bn(raw):
    """Fold each BatchNorm (eval mode, running stats) into the preceding bias-free conv."""
    def sc(g, b, m, v):
        s = g * jax.lax.rsqrt(v + BN_EPS)
        return s, b - m * s
    s1, t1 = sc(raw["bn1_g"], raw["bn1_b"], raw["bn1_m"], raw["bn1_v"])
    s2, t2 = sc(raw["bn2_g"], raw["bn2_b"], raw["bn2_m"], raw["bn2_v"])
    s3, t3 = sc(raw["bn3_g"], raw["bn3_b"], raw["bn3_m"], raw["bn3_v"])
    w1 = (raw["conv1_w"][:, :, 0, 0] * s1[:, None]).T                        # (Cin, HIDDEN)
    w2 = jnp.transpose(raw["conv2_w"][:, 0], (1, 2, 0)) * s2[None, None, :]  # (3, 3, HIDDEN)
    w3 = (raw["conv3_w"][:, :, 0, 0] * s3[:, None]).T                        # (HIDDEN, Cout)
    return {"w1": w1, "b1": t1.reshape(1, -1),
            "w2": w2, "b2": t2.reshape(1, -1),
            "w3": w3, "b3": t3.reshape(1, -1)}


# ---------------------------- pure-JAX reference (unfused) ----------------------------
def reference_forward(x, raw):
    """Unfused MBConv forward in NCHW (conv -> BN -> act), BN in eval mode."""
    def bn(y, g, b, m, v):
        s = (g / jnp.sqrt(v + BN_EPS))[None, :, None, None]
        return (y - m[None, :, None, None]) * s + b[None, :, None, None]

    shortcut = x
    y = lax.conv_general_dilated(x, raw["conv1_w"], (1, 1), "VALID",
                                 dimension_numbers=("NCHW", "OIHW", "NCHW"))
    y = _gelu(bn(y, raw["bn1_g"], raw["bn1_b"], raw["bn1_m"], raw["bn1_v"]))
    y = lax.conv_general_dilated(y, raw["conv2_w"], (1, 1), ((1, 1), (1, 1)),
                                 dimension_numbers=("NCHW", "OIHW", "NCHW"),
                                 feature_group_count=HIDDEN)
    y = _gelu(bn(y, raw["bn2_g"], raw["bn2_b"], raw["bn2_m"], raw["bn2_v"]))
    y = lax.conv_general_dilated(y, raw["conv3_w"], (1, 1), "VALID",
                                 dimension_numbers=("NCHW", "OIHW", "NCHW"))
    y = bn(y, raw["bn3_g"], raw["bn3_b"], raw["bn3_m"], raw["bn3_v"])
    y = y + shortcut                        # drop_path == Identity at inference
    return _gelu(y)


if __name__ == "__main__":
    key = jax.random.PRNGKey(0)
    kx, kp = jax.random.split(key)
    x = jax.random.normal(kx, (BATCH, IN_CHANS, H, W), jnp.float32)

    raw = build_raw_params(kp)
    folded = fold_bn(raw)

    out = mbconv_forward(x, folded)
    out = jax.block_until_ready(out)

    ref = reference_forward(x, raw)
    # Tolerance covers the TPU MXU's reduced-precision default f32 matmul/conv
    # passes plus BN-folding reassociation; a real bug (e.g. a padding
    # off-by-one in the depthwise conv) would produce O(1) errors.
    np.testing.assert_allclose(np.asarray(out), np.asarray(ref), rtol=2e-2, atol=2e-2)
    print("KERNEL_OK")
</pallas_src>

<mosaic_0001>
module attributes {stable_mosaic.version = 11 : i64} {
  func.func @mbconv_kernel(%arg0: memref<2x8x8x32xf32, #tpu.memory_space<vmem>>, %arg1: memref<32x128xf32, #tpu.memory_space<vmem>>, %arg2: memref<1x128xf32, #tpu.memory_space<vmem>>, %arg3: memref<3x3x128xf32, #tpu.memory_space<vmem>>, %arg4: memref<1x128xf32, #tpu.memory_space<vmem>>, %arg5: memref<128x32xf32, #tpu.memory_space<vmem>>, %arg6: memref<1x32xf32, #tpu.memory_space<vmem>>, %arg7: memref<2x8x8x32xf32, #tpu.memory_space<vmem>>, %arg8: memref<2x10x10x128xf32, #tpu.memory_space<vmem>>) attributes {dimension_semantics = [], scalar_prefetch = 0 : i64, scratch_operands = 1 : i64, tpu.core_type = #tpu.core_type<tc>} {
    %c0 = arith.constant 0 : index
    %c0_0 = arith.constant 0 : index
    %c0_1 = arith.constant 0 : index
    %c0_2 = arith.constant 0 : index
    %0 = vector.load %arg0[%c0, %c0_0, %c0_1, %c0_2] : memref<2x8x8x32xf32, #tpu.memory_space<vmem>>, vector<2x8x8x32xf32>
    %1 = vector.shape_cast %0 : vector<2x8x8x32xf32> to vector<128x32xf32>
    %c0_3 = arith.constant 0 : index
    %c0_4 = arith.constant 0 : index
    %2 = vector.load %arg1[%c0_3, %c0_4] : memref<32x128xf32, #tpu.memory_space<vmem>>, vector<32x128xf32>
    %cst = arith.constant dense<0.000000e+00> : vector<128x128xf32>
    %3 = tpu.matmul %1, %2, %cst {dimension_numbers = #tpu.dot_dimension_numbers<[1], [0], [0], [1], [0, 0, 1, 1], [], []>} : vector<128x32xf32>, vector<32x128xf32>, vector<128x128xf32> -> vector<128x128xf32>
    %c0_5 = arith.constant 0 : index
    %c0_6 = arith.constant 0 : index
    %4 = vector.load %arg2[%c0_5, %c0_6] : memref<1x128xf32, #tpu.memory_space<vmem>>, vector<1x128xf32>
    %5 = vector.broadcast %4 : vector<1x128xf32> to vector<128x128xf32>
    %6 = arith.addf %3, %5 : vector<128x128xf32>
    %cst_7 = arith.constant 5.000000e-01 : f32
    %7 = vector.broadcast %cst_7 : f32 to vector<128x128xf32>
    %8 = arith.mulf %7, %6 : vector<128x128xf32>
    %9 = arith.mulf %6, %6 : vector<128x128xf32>
    %10 = arith.mulf %9, %6 : vector<128x128xf32>
    %cst_8 = arith.constant 4.471500e-02 : f32
    %11 = vector.broadcast %cst_8 : f32 to vector<128x128xf32>
    %12 = arith.mulf %11, %10 : vector<128x128xf32>
    %13 = arith.addf %6, %12 : vector<128x128xf32>
    %cst_9 = arith.constant 0.797884583 : f32
    %14 = vector.broadcast %cst_9 : f32 to vector<128x128xf32>
    %15 = arith.mulf %14, %13 : vector<128x128xf32>
    %16 = math.tanh %15 : vector<128x128xf32>
    %cst_10 = arith.constant 1.000000e+00 : f32
    %17 = vector.broadcast %cst_10 : f32 to vector<128x128xf32>
    %18 = arith.addf %17, %16 : vector<128x128xf32>
    %19 = arith.mulf %8, %18 : vector<128x128xf32>
    %cst_11 = arith.constant 0.000000e+00 : f32
    %20 = vector.broadcast %cst_11 : f32 to vector<2x10x10x128xf32>
    %c0_12 = arith.constant 0 : index
    %c0_13 = arith.constant 0 : index
    %c0_14 = arith.constant 0 : index
    %c0_15 = arith.constant 0 : index
    %21 = vector.load %arg8[%c0_12, %c0_13, %c0_14, %c0_15] : memref<2x10x10x128xf32, #tpu.memory_space<vmem>>, vector<2x10x10x128xf32>
    tpu.vector_store %arg8[%c0_12, %c0_13, %c0_14, %c0_15], %20 {strides = array<i32>} : memref<2x10x10x128xf32, #tpu.memory_space<vmem>>, vector<2x10x10x128xf32>,
    %22 = vector.shape_cast %19 : vector<128x128xf32> to vector<2x8x8x128xf32>
    %c0_16 = arith.constant 0 : index
    %c1 = arith.constant 1 : index
    %c1_17 = arith.constant 1 : index
    %c0_18 = arith.constant 0 : index
    %23 = vector.load %arg8[%c0_16, %c1, %c1_17, %c0_18] : memref<2x10x10x128xf32, #tpu.memory_space<vmem>>, vector<2x8x8x128xf32>
    tpu.vector_store %arg8[%c0_16, %c1, %c1_17, %c0_18], %22 {strides = array<i32>} : memref<2x10x10x128xf32, #tpu.memory_space<vmem>>, vector<2x8x8x128xf32>,
    %c0_19 = arith.constant 0 : index
    %c0_20 = arith.constant 0 : index
    %24 = vector.load %arg4[%c0_19, %c0_20] : memref<1x128xf32, #tpu.memory_space<vmem>>, vector<1x128xf32>
    %25 = vector.shape_cast %24 : vector<1x128xf32> to vector<1x1x1x128xf32>
    %26 = vector.shape_cast %25 : vector<1x1x1x128xf32> to vector<1x1x1x128xf32>
    %27 = vector.broadcast %26 : vector<1x1x1x128xf32> to vector<2x8x8x128xf32>
    %c0_21 = arith.constant 0 : index
    %c0_22 = arith.constant 0 : index
    %c0_23 = arith.constant 0 : index
    %28 = vector.load %arg3[%c0_21, %c0_22, %c0_23] : memref<3x3x128xf32, #tpu.memory_space<vmem>>, vector<1x1x128xf32>
    %29 = vector.shape_cast %28 : vector<1x1x128xf32> to vector<128xf32>
    %30 = vector.shape_cast %29 : vector<128xf32> to vector<1x1x1x128xf32>
    %c0_24 = arith.constant 0 : index
    %c0_25 = arith.constant 0 : index
    %c0_26 = arith.constant 0 : index
    %c0_27 = arith.constant 0 : index
    %31 = vector.load %arg8[%c0_24, %c0_25, %c0_26, %c0_27] : memref<2x10x10x128xf32, #tpu.memory_space<vmem>>, vector<2x8x8x128xf32>
    %32 = vector.broadcast %30 : vector<1x1x1x128xf32> to vector<2x8x8x128xf32>
    %33 = arith.mulf %31, %32 : vector<2x8x8x128xf32>
    %34 = arith.addf %27, %33 : vector<2x8x8x128xf32>
    %c0_28 = arith.constant 0 : index
    %c1_29 = arith.constant 1 : index
    %c0_30 = arith.constant 0 : index
    %35 = vector.load %arg3[%c0_28, %c1_29, %c0_30] : memref<3x3x128xf32, #tpu.memory_space<vmem>>, vector<1x1x128xf32>
    %36 = vector.shape_cast %35 : vector<1x1x128xf32> to vector<128xf32>
    %37 = vector.shape_cast %36 : vector<128xf32> to vector<1x1x1x128xf32>
    %c0_31 = arith.constant 0 : index
    %c0_32 = arith.constant 0 : index
    %c1_33 = arith.constant 1 : index
    %c0_34 = arith.constant 0 : index
    %38 = vector.load %arg8[%c0_31, %c0_32, %c1_33, %c0_34] : memref<2x10x10x128xf32, #tpu.memory_space<vmem>>, vector<2x8x8x128xf32>
    %39 = vector.broadcast %37 : vector<1x1x1x128xf32> to vector<2x8x8x128xf32>
    %40 = arith.mulf %38, %39 : vector<2x8x8x128xf32>
    %41 = arith.addf %34, %40 : vector<2x8x8x128xf32>
    %c0_35 = arith.constant 0 : index
    %c2 = arith.constant 2 : index
    %c0_36 = arith.constant 0 : index
    %42 = vector.load %arg3[%c0_35, %c2, %c0_36] : memref<3x3x128xf32, #tpu.memory_space<vmem>>, vector<1x1x128xf32>
    %43 = vector.shape_cast %42 : vector<1x1x128xf32> to vector<128xf32>
    %44 = vector.shape_cast %43 : vector<128xf32> to vector<1x1x1x128xf32>
    %c0_37 = arith.constant 0 : index
    %c0_38 = arith.constant 0 : index
    %c2_39 = arith.constant 2 : index
    %c0_40 = arith.constant 0 : index
    %45 = vector.load %arg8[%c0_37, %c0_38, %c2_39, %c0_40] : memref<2x10x10x128xf32, #tpu.memory_space<vmem>>, vector<2x8x8x128xf32>
    %46 = vector.broadcast %44 : vector<1x1x1x128xf32> to vector<2x8x8x128xf32>
    %47 = arith.mulf %45, %46 : vector<2x8x8x128xf32>
    %48 = arith.addf %41, %47 : vector<2x8x8x128xf32>
    %c1_41 = arith.constant 1 : index
    %c0_42 = arith.constant 0 : index
    %c0_43 = arith.constant 0 : index
    %49 = vector.load %arg3[%c1_41, %c0_42, %c0_43] : memref<3x3x128xf32, #tpu.memory_space<vmem>>, vector<1x1x128xf32>
    %50 = vector.shape_cast %49 : vector<1x1x128xf32> to vector<128xf32>
    %51 = vector.shape_cast %50 : vector<128xf32> to vector<1x1x1x128xf32>
    %c0_44 = arith.constant 0 : index
    %c1_45 = arith.constant 1 : index
    %c0_46 = arith.constant 0 : index
    %c0_47 = arith.constant 0 : index
    %52 = vector.load %arg8[%c0_44, %c1_45, %c0_46, %c0_47] : memref<2x10x10x128xf32, #tpu.memory_space<vmem>>, vector<2x8x8x128xf32>
    %53 = vector.broadcast %51 : vector<1x1x1x128xf32> to vector<2x8x8x128xf32>
    %54 = arith.mulf %52, %53 : vector<2x8x8x128xf32>
    %55 = arith.addf %48, %54 : vector<2x8x8x128xf32>
    %c1_48 = arith.constant 1 : index
    %c1_49 = arith.constant 1 : index
    %c0_50 = arith.constant 0 : index
    %56 = vector.load %arg3[%c1_48, %c1_49, %c0_50] : memref<3x3x128xf32, #tpu.memory_space<vmem>>, vector<1x1x128xf32>
    %57 = vector.shape_cast %56 : vector<1x1x128xf32> to vector<128xf32>
    %58 = vector.shape_cast %57 : vector<128xf32> to vector<1x1x1x128xf32>
    %c0_51 = arith.constant 0 : index
    %c1_52 = arith.constant 1 : index
    %c1_53 = arith.constant 1 : index
    %c0_54 = arith.constant 0 : index
    %59 = vector.load %arg8[%c0_51, %c1_52, %c1_53, %c0_54] : memref<2x10x10x128xf32, #tpu.memory_space<vmem>>, vector<2x8x8x128xf32>
    %60 = vector.broadcast %58 : vector<1x1x1x128xf32> to vector<2x8x8x128xf32>
    %61 = arith.mulf %59, %60 : vector<2x8x8x128xf32>
    %62 = arith.addf %55, %61 : vector<2x8x8x128xf32>
    %c1_55 = arith.constant 1 : index
    %c2_56 = arith.constant 2 : index
    %c0_57 = arith.constant 0 : index
    %63 = vector.load %arg3[%c1_55, %c2_56, %c0_57] : memref<3x3x128xf32, #tpu.memory_space<vmem>>, vector<1x1x128xf32>
    %64 = vector.shape_cast %63 : vector<1x1x128xf32> to vector<128xf32>
    %65 = vector.shape_cast %64 : vector<128xf32> to vector<1x1x1x128xf32>
    %c0_58 = arith.constant 0 : index
    %c1_59 = arith.constant 1 : index
    %c2_60 = arith.constant 2 : index
    %c0_61 = arith.constant 0 : index
    %66 = vector.load %arg8[%c0_58, %c1_59, %c2_60, %c0_61] : memref<2x10x10x128xf32, #tpu.memory_space<vmem>>, vector<2x8x8x128xf32>
    %67 = vector.broadcast %65 : vector<1x1x1x128xf32> to vector<2x8x8x128xf32>
    %68 = arith.mulf %66, %67 : vector<2x8x8x128xf32>
    %69 = arith.addf %62, %68 : vector<2x8x8x128xf32>
    %c2_62 = arith.constant 2 : index
    %c0_63 = arith.constant 0 : index
    %c0_64 = arith.constant 0 : index
    %70 = vector.load %arg3[%c2_62, %c0_63, %c0_64] : memref<3x3x128xf32, #tpu.memory_space<vmem>>, vector<1x1x128xf32>
    %71 = vector.shape_cast %70 : vector<1x1x128xf32> to vector<128xf32>
    %72 = vector.shape_cast %71 : vector<128xf32> to vector<1x1x1x128xf32>
    %c0_65 = arith.constant 0 : index
    %c2_66 = arith.constant 2 : index
    %c0_67 = arith.constant 0 : index
    %c0_68 = arith.constant 0 : index
    %73 = vector.load %arg8[%c0_65, %c2_66, %c0_67, %c0_68] : memref<2x10x10x128xf32, #tpu.memory_space<vmem>>, vector<2x8x8x128xf32>
    %74 = vector.broadcast %72 : vector<1x1x1x128xf32> to vector<2x8x8x128xf32>
    %75 = arith.mulf %73, %74 : vector<2x8x8x128xf32>
    %76 = arith.addf %69, %75 : vector<2x8x8x128xf32>
    %c2_69 = arith.constant 2 : index
    %c1_70 = arith.constant 1 : index
    %c0_71 = arith.constant 0 : index
    %77 = vector.load %arg3[%c2_69, %c1_70, %c0_71] : memref<3x3x128xf32, #tpu.memory_space<vmem>>, vector<1x1x128xf32>
    %78 = vector.shape_cast %77 : vector<1x1x128xf32> to vector<128xf32>
    %79 = vector.shape_cast %78 : vector<128xf32> to vector<1x1x1x128xf32>
    %c0_72 = arith.constant 0 : index
    %c2_73 = arith.constant 2 : index
    %c1_74 = arith.constant 1 : index
    %c0_75 = arith.constant 0 : index
    %80 = vector.load %arg8[%c0_72, %c2_73, %c1_74, %c0_75] : memref<2x10x10x128xf32, #tpu.memory_space<vmem>>, vector<2x8x8x128xf32>
    %81 = vector.broadcast %79 : vector<1x1x1x128xf32> to vector<2x8x8x128xf32>
    %82 = arith.mulf %80, %81 : vector<2x8x8x128xf32>
    %83 = arith.addf %76, %82 : vector<2x8x8x128xf32>
    %c2_76 = arith.constant 2 : index
    %c2_77 = arith.constant 2 : index
    %c0_78 = arith.constant 0 : index
    %84 = vector.load %arg3[%c2_76, %c2_77, %c0_78] : memref<3x3x128xf32, #tpu.memory_space<vmem>>, vector<1x1x128xf32>
    %85 = vector.shape_cast %84 : vector<1x1x128xf32> to vector<128xf32>
    %86 = vector.shape_cast %85 : vector<128xf32> to vector<1x1x1x128xf32>
    %c0_79 = arith.constant 0 : index
    %c2_80 = arith.constant 2 : index
    %c2_81 = arith.constant 2 : index
    %c0_82 = arith.constant 0 : index
    %87 = vector.load %arg8[%c0_79, %c2_80, %c2_81, %c0_82] : memref<2x10x10x128xf32, #tpu.memory_space<vmem>>, vector<2x8x8x128xf32>
    %88 = vector.broadcast %86 : vector<1x1x1x128xf32> to vector<2x8x8x128xf32>
    %89 = arith.mulf %87, %88 : vector<2x8x8x128xf32>
    %90 = arith.addf %83, %89 : vector<2x8x8x128xf32>
    %cst_83 = arith.constant 5.000000e-01 : f32
    %91 = vector.broadcast %cst_83 : f32 to vector<2x8x8x128xf32>
    %92 = arith.mulf %91, %90 : vector<2x8x8x128xf32>
    %93 = arith.mulf %90, %90 : vector<2x8x8x128xf32>
    %94 = arith.mulf %93, %90 : vector<2x8x8x128xf32>
    %cst_84 = arith.constant 4.471500e-02 : f32
    %95 = vector.broadcast %cst_84 : f32 to vector<2x8x8x128xf32>
    %96 = arith.mulf %95, %94 : vector<2x8x8x128xf32>
    %97 = arith.addf %90, %96 : vector<2x8x8x128xf32>
    %cst_85 = arith.constant 0.797884583 : f32
    %98 = vector.broadcast %cst_85 : f32 to vector<2x8x8x128xf32>
    %99 = arith.mulf %98, %97 : vector<2x8x8x128xf32>
    %100 = math.tanh %99 : vector<2x8x8x128xf32>
    %cst_86 = arith.constant 1.000000e+00 : f32
    %101 = vector.broadcast %cst_86 : f32 to vector<2x8x8x128xf32>
    %102 = arith.addf %101, %100 : vector<2x8x8x128xf32>
    %103 = arith.mulf %92, %102 : vector<2x8x8x128xf32>
    %104 = vector.shape_cast %103 : vector<2x8x8x128xf32> to vector<128x128xf32>
    %c0_87 = arith.constant 0 : index
    %c0_88 = arith.constant 0 : index
    %105 = vector.load %arg5[%c0_87, %c0_88] : memref<128x32xf32, #tpu.memory_space<vmem>>, vector<128x32xf32>
    %cst_89 = arith.constant dense<0.000000e+00> : vector<128x32xf32>
    %106 = tpu.matmul %104, %105, %cst_89 {dimension_numbers = #tpu.dot_dimension_numbers<[1], [0], [0], [1], [0, 0, 1, 1], [], []>} : vector<128x128xf32>, vector<128x32xf32>, vector<128x32xf32> -> vector<128x32xf32>
    %c0_90 = arith.constant 0 : index
    %c0_91 = arith.constant 0 : index
    %107 = vector.load %arg6[%c0_90, %c0_91] : memref<1x32xf32, #tpu.memory_space<vmem>>, vector<1x32xf32>
    %108 = vector.broadcast %107 : vector<1x32xf32> to vector<128x32xf32>
    %109 = arith.addf %106, %108 : vector<128x32xf32>
    %110 = arith.addf %109, %1 : vector<128x32xf32>
    %cst_92 = arith.constant 5.000000e-01 : f32
    %111 = vector.broadcast %cst_92 : f32 to vector<128x32xf32>
    %112 = arith.mulf %111, %110 : vector<128x32xf32>
    %113 = arith.mulf %110, %110 : vector<128x32xf32>
    %114 = arith.mulf %113, %110 : vector<128x32xf32>
    %cst_93 = arith.constant 4.471500e-02 : f32
    %115 = vector.broadcast %cst_93 : f32 to vector<128x32xf32>
    %116 = arith.mulf %115, %114 : vector<128x32xf32>
    %117 = arith.addf %110, %116 : vector<128x32xf32>
    %cst_94 = arith.constant 0.797884583 : f32
    %118 = vector.broadcast %cst_94 : f32 to vector<128x32xf32>
    %119 = arith.mulf %118, %117 : vector<128x32xf32>
    %120 = math.tanh %119 : vector<128x32xf32>
    %cst_95 = arith.constant 1.000000e+00 : f32
    %121 = vector.broadcast %cst_95 : f32 to vector<128x32xf32>
    %122 = arith.addf %121, %120 : vector<128x32xf32>
    %123 = arith.mulf %112, %122 : vector<128x32xf32>
    %124 = vector.shape_cast %123 : vector<128x32xf32> to vector<2x8x8x32xf32>
    %c0_96 = arith.constant 0 : index
    %c0_97 = arith.constant 0 : index
    %c0_98 = arith.constant 0 : index
    %c0_99 = arith.constant 0 : index
    %125 = vector.load %arg7[%c0_96, %c0_97, %c0_98, %c0_99] : memref<2x8x8x32xf32, #tpu.memory_space<vmem>>, vector<2x8x8x32xf32>
    tpu.vector_store %arg7[%c0_96, %c0_97, %c0_98, %c0_99], %124 {strides = array<i32>} : memref<2x8x8x32xf32, #tpu.memory_space<vmem>>, vector<2x8x8x32xf32>,
    return
  }
}

</mosaic_0001>

<bundles_post_ra>
// kernel: tpu_custom_call.1
= control target key start
LH: loop header
LB: loop body
LE: loop exit
PB: predicated region body
PF: predicated region fallthrough
CT: control target
= control target key end

     0   :  { %12 = vsyncpa [#allocation4], 0  ;;  %s2609_s0 = inlined_call_operand.vmem [shape: f32[2,8,8,32], index: 0, kind: input, shape index: {}]   ;;  %s2610_s1 = inlined_call_operand.vmem [shape: f32[32,128], index: 1, kind: input, shape index: {}]   ;;  %s2611_s2 = inlined_call_operand.vmem [shape: f32[1,128], index: 2, kind: input, shape index: {}]   ;;  %s2612_s3 = inlined_call_operand.hbm [shape: f32[3,3,128], index: 3, kind: input, shape index: {}]   ;;  %s2613_s4 = inlined_call_operand.vmem [shape: f32[1,128], index: 4, kind: input, shape index: {}]   ;;  %s2614_s5 = inlined_call_operand.vmem [shape: f32[128,32], index: 5, kind: input, shape index: {}]   ;;  %s2615_s6 = inlined_call_operand.vmem [shape: f32[1,32], index: 6, kind: input, shape index: {}]   ;;  %s2616_s7 = inlined_call_operand.hbm [shape: f32[2,8,8,32], index: 7, kind: output, shape index: {}]  }
   0x1   :  { %13 = vsyncpa [#allocation5], 0  ;;  %s1824_s24 = smov [#allocation3]  }
   0x2   :  { %s25_s25 = sshll.u32 %s1824_s24, 4  ;;  %s26_s25 = int_to_ptr.vmem [resolvable:$true] %s25_s25 }
   0x3   :  { %s1788_s26 = scalar_lea.vmem %s26_s25, 192  ;;  %p1793_p1 = scmp.lt.s32.totalorder %s26_s25, %s26_s25 }
   0x4   :  { %p1789_p0 = scmp.ne.s32.totalorder %s26_s25, %s1788_s26  ;;  %p1794_p2 = scmp.lt.s32.totalorder %s1788_s26, %s1788_s26 }
   0x6   :  { %p1795_p3 = por %p1794_p2, %p1793_p1 }
   0x8   :  { %p1796_p4 = pnand %p1795_p3, %p1789_p0 }
   0xa   :  { %1799 = shalt.err (!%p1796_p4)
}
   0xb   :  { %s1825_s27 = smov 64   ;;  %s1826_s28 = smov 4  }
   0xc   :  { %31 = dma.hbm_to_vmem [thread:$0]  %s2612_s3, 192, %s26_s25, [#allocation4], %s1825_s27, %s1825_s27, %s1826_s28  }
   0xd   :  { %1820 = dma.done.wait [#allocation4], 192  }
   0xe   :  { %1821 = vsyncadd [#allocation4], 4294967104  ;;  %vm68_vm0 = vcmask 261120   ;;  %v60_v0 = vld [vmem:[%s2610_s1 + $0x18] sm:$0xff]  ;;  %v59_v1 = vld [vmem:[%s2610_s1 + $0x10] sm:$0xff]  ;;  %v1827_v20 = vmov 0.0  }
   0xf   :  { %1535 = vmatprep.subr.mxu0 %v60_v0  ;;  %v41_v2 = vld [vmem:[%s2609_s0] sm:$0xff]  ;;  %v58_v3 = vld [vmem:[%s2610_s1 + $0x8] sm:$0xff]  ;;  %v43_v6 = vld [vmem:[%s2609_s0 + $0x10] sm:$0xff]  ;;  %410 = vst [vmem:[#allocation2 + $0x20] sm:$0xff] %v1827_v20 }
  0x10   :  { %1536 = vmatpush3.msra.mxu0 %v60_v0  ;;  %1543 = vmatprep.mubr.msk.f32.mxu0 %vm68_vm0, %v41_v2  ;;  %v57_v4 = vld [vmem:[%s2610_s1] sm:$0xff]  ;;  %v42_v5 = vld [vmem:[%s2609_s0 + $0x8] sm:$0xff]  ;;  %v44_v7 = vld [vmem:[%s2609_s0 + $0x18] sm:$0xff]  ;;  %411 = vst [vmem:[#allocation2 + $0x28] sm:$0x3] %v1827_v20 }
  0x11   :  { %1537 = vmatprep.subr.mxu0 %v59_v1  ;;  %v45_v8 = vld [vmem:[%s2609_s0 + $0x20] sm:$0xff]  ;;  %v46_v9 = vld [vmem:[%s2609_s0 + $0x28] sm:$0xff]  ;;  %v47_v10 = vld [vmem:[%s2609_s0 + $0x30] sm:$0xff]  ;;  %406 = vst [vmem:[#allocation2] sm:$0xff] %v1827_v20 }
  0x12   :  { %1538 = vmatpush3.msra.mxu0 %v59_v1  ;;  %v48_v11 = vld [vmem:[%s2609_s0 + $0x38] sm:$0xff]  ;;  %v49_v12 = vld [vmem:[%s2609_s0 + $0x40] sm:$0xff]  ;;  %v50_v13 = vld [vmem:[%s2609_s0 + $0x48] sm:$0xff]  ;;  %407 = vst [vmem:[#allocation2 + $0x8] sm:$0x3] %v1827_v20 }
  0x13   :  { %1539 = vmatprep.subr.mxu0 %v58_v3  ;;  %v51_v14 = vld [vmem:[%s2609_s0 + $0x50] sm:$0xff]  ;;  %v52_v15 = vld [vmem:[%s2609_s0 + $0x58] sm:$0xff]  ;;  %v53_v16 = vld [vmem:[%s2609_s0 + $0x60] sm:$0xff]  ;;  %408 = vst [vmem:[#allocation2 + $0x10] sm:$0xff] %v1827_v20 }
  0x14   :  { %1540 = vmatpush3.msra.mxu0 %v58_v3  ;;  %v54_v17 = vld [vmem:[%s2609_s0 + $0x68] sm:$0xff]  ;;  %v55_v18 = vld [vmem:[%s2609_s0 + $0x70] sm:$0xff]  ;;  %v56_v19 = vld [vmem:[%s2609_s0 + $0x78] sm:$0xff]  ;;  %409 = vst [vmem:[#allocation2 + $0x18] sm:$0x3] %v1827_v20 }
  0x15   :  { %1541 = vmatprep.subr.mxu0 %v57_v4  ;;  %412 = vst [vmem:[#allocation2 + $0x30] sm:$0xff] %v1827_v20  ;;  %413 = vst [vmem:[#allocation2 + $0x38] sm:$0x3] %v1827_v20  ;;  %v1109_v21 = vld [vmem:[%s2614_s5 + $0x78] sm:$0xff]  ;;  %v1108_v22 = vld [vmem:[%s2614_s5 + $0x70] sm:$0xff] }
  0x16   :  { %1542 = vmatpush3.msra.mxu0 %v57_v4  ;;  %414 = vst [vmem:[#allocation2 + $0x40] sm:$0xff] %v1827_v20  ;;  %415 = vst [vmem:[#allocation2 + $0x48] sm:$0x3] %v1827_v20  ;;  %1623 = vmatprep.subr.mxu1 %v1109_v21  ;;  %v1107_v23 = vld [vmem:[%s2614_s5 + $0x68] sm:$0xff]  ;;  %v1106_v24 = vld [vmem:[%s2614_s5 + $0x60] sm:$0xff] }
  0x17   :  { %1544 = vmatmul.mubr.msk.f32.vlgmr.msra.gmra.mxu0 %vm68_vm0, %v42_v5  ;;  %416 = vst [vmem:[#allocation2 + $0x50] sm:$0xff] %v1827_v20  ;;  %417 = vst [vmem:[#allocation2 + $0x58] sm:$0x3] %v1827_v20  ;;  %1567 = vmatprep.subr.mxu0 %v1109_v21  ;;  %v1105_v25 = vld [vmem:[%s2614_s5 + $0x58] sm:$0xff]  ;;  %v1104_v26 = vld [vmem:[%s2614_s5 + $0x50] sm:$0xff] }
  0x18   :  { %1546 = vmatprep.mubr.msk.f32.mxu0 %vm68_vm0, %v43_v6  ;;  %418 = vst [vmem:[#allocation2 + $0x60] sm:$0xff] %v1827_v20  ;;  %419 = vst [vmem:[#allocation2 + $0x68] sm:$0x3] %v1827_v20  ;;  %1568 = vmatpush3.msra.mxu0 %v1109_v21  ;;  %v1103_v27 = vld [vmem:[%s2614_s5 + $0x48] sm:$0xff]  ;;  %v1102_v28 = vld [vmem:[%s2614_s5 + $0x40] sm:$0xff] }
  0x19   :  { %420 = vst [vmem:[#allocation2 + $0x70] sm:$0xff] %v1827_v20  ;;  %421 = vst [vmem:[#allocation2 + $0x78] sm:$0x3] %v1827_v20  ;;  %1639 = vmatpush3.msra.mxu1 %v1109_v21  ;;  %1569 = vmatprep.subr.mxu0 %v1108_v22  ;;  %v1101_v29 = vld [vmem:[%s2614_s5 + $0x38] sm:$0xff]  ;;  %v1100_v30 = vld [vmem:[%s2614_s5 + $0x30] sm:$0xff] }
  0x1a   :  { %422 = vst [vmem:[#allocation2 + $0x80] sm:$0xff] %v1827_v20  ;;  %423 = vst [vmem:[#allocation2 + $0x88] sm:$0x3] %v1827_v20  ;;  %1624 = vmatprep.subr.mxu1 %v1108_v22  ;;  %1570 = vmatpush3.msra.mxu0 %v1108_v22  ;;  %v1099_v31 = vld [vmem:[%s2614_s5 + $0x28] sm:$0xff]  ;;  %v1098_v32 = vld [vmem:[%s2614_s5 + $0x20] sm:$0xff] }
  0x1b   :  { %1547 = vmatmul.mubr.msk.f32.gmra.mxu0 %vm68_vm0, %v44_v7  ;;  %424 = vst [vmem:[#allocation2 + $0x90] sm:$0xff] %v1827_v20  ;;  %425 = vst [vmem:[#allocation2 + $0x98] sm:$0x3] %v1827_v20  ;;  %1640 = vmatpush3.msra.mxu1 %v1108_v22  ;;  %v1097_v33 = vld [vmem:[%s2614_s5 + $0x18] sm:$0xff]  ;;  %v1096_v34 = vld [vmem:[%s2614_s5 + $0x10] sm:$0xff] }
  0x1c   :  { %1549 = vmatprep.mubr.msk.f32.mxu0 %vm68_vm0, %v45_v8  ;;  %426 = vst [vmem:[#allocation2 + $0xa0] sm:$0xff] %v1827_v20  ;;  %427 = vst [vmem:[#allocation2 + $0xa8] sm:$0x3] %v1827_v20  ;;  %1571 = vmatprep.subr.mxu0 %v1107_v23  ;;  %v1095_v35 = vld [vmem:[%s2614_s5 + $0x8] sm:$0xff]  ;;  %v1094_v36 = vld [vmem:[%s2614_s5] sm:$0xff] }
  0x1d   :  { %428 = vst [vmem:[#allocation2 + $0xb0] sm:$0xff] %v1827_v20  ;;  %429 = vst [vmem:[#allocation2 + $0xb8] sm:$0x3] %v1827_v20  ;;  %1625 = vmatprep.subr.mxu1 %v1107_v23  ;;  %1572 = vmatpush3.msra.mxu0 %v1107_v23  ;;  %v1998_v37 = vld [vmem:[#allocation3] ss:$0 sm:$0xff]  ;;  %v524_v41 = vld [vmem:[#allocation2 + $0x1] sm:$0xff] }
  0x1e   :  { %430 = vst [vmem:[#allocation2 + $0xc0] sm:$0xff] %v1827_v20  ;;  %431 = vst [vmem:[#allocation2 + $0xc8] sm:$0x3] %v1827_v20  ;;  %1641 = vmatpush3.msra.mxu1 %v1107_v23  ;;  %1573 = vmatprep.subr.mxu0 %v1106_v24  ;;  %v2003_v38 = vld [vmem:[%s2611_s2] ss:$0 sm:$0xff]  ;;  %v491_v39 = vmul.f32 0.0, %v1998_v37 }
  0x1f   :  { %1550 = vmatmul.mubr.msk.f32.gmra.mxu0 %vm68_vm0, %v46_v9  ;;  %432 = vst [vmem:[#allocation2 + $0xd0] sm:$0xff] %v1827_v20  ;;  %433 = vst [vmem:[#allocation2 + $0xd8] sm:$0x3] %v1827_v20  ;;  %1626 = vmatprep.subr.mxu1 %v1106_v24  ;;  %v2009_v40 = vld [vmem:[%s2613_s4] ss:$0 sm:$0xff]  ;;  %v577_v53 = vld [vmem:[#allocation2 + $0x2] sm:$0xff] }
  0x20   :  { %1552 = vmatprep.mubr.msk.f32.mxu0 %vm68_vm0, %v47_v10  ;;  %434 = vst [vmem:[#allocation2 + $0xe0] sm:$0xff] %v1827_v20  ;;  %435 = vst [vmem:[#allocation2 + $0xe8] sm:$0x3] %v1827_v20  ;;  %1574 = vmatpush3.msra.mxu0 %v1106_v24  ;;  %v2012_v44 = vld [vmem:[#allocation3 + $0x1] ss:$0 sm:$0xff]  ;;  %v507_v47 = vadd.f32 %v2009_v40, %v491_v39 }
  0x21   :  { %436 = vst [vmem:[#allocation2 + $0xf0] sm:$0xff] %v1827_v20  ;;  %437 = vst [vmem:[#allocation2 + $0xf8] sm:$0x3] %v1827_v20  ;;  %1642 = vmatpush3.msra.mxu1 %v1106_v24  ;;  %1575 = vmatprep.subr.mxu0 %v1105_v25  ;;  %v544_v48 = vmul.f32 %v2012_v44, %v524_v41  ;;  %v2017_v52 = vld [vmem:[#allocation3 + $0x2] ss:$0 sm:$0xff] }
  0x22   :  { %438 = vst [vmem:[#allocation2 + $0x100] sm:$0xff] %v1827_v20  ;;  %439 = vst [vmem:[#allocation2 + $0x108] sm:$0x3] %v1827_v20  ;;  %1627 = vmatprep.subr.mxu1 %v1105_v25  ;;  %1576 = vmatpush3.msra.mxu0 %v1105_v25  ;;  %v597_v0 = vmul.f32 %v2017_v52, %v577_v53  ;;  %v2039_v24 = vld [vmem:[#allocation3 + $0x8] ss:$0 sm:$0xff] }
  0x23   :  { %1553 = vmatmul.mubr.msk.f32.gmra.mxu0 %vm68_vm0, %v48_v11  ;;  %440 = vst [vmem:[#allocation2 + $0x110] sm:$0xff] %v1827_v20  ;;  %441 = vst [vmem:[#allocation2 + $0x118] sm:$0x3] %v1827_v20  ;;  %1643 = vmatpush3.msra.mxu1 %v1105_v25  ;;  %v532_v45 = vld [vmem:[#allocation2 + $0xa1] sm:$0xff]  ;;  %v560_v60 = vadd.f32 %v544_v48, %v507_v47 }
  0x24   :  { %1555 = vmatprep.mubr.msk.f32.mxu0 %vm68_vm0, %v49_v12  ;;  %442 = vst [vmem:[#allocation2 + $0x120] sm:$0xff] %v1827_v20  ;;  %443 = vst [vmem:[#allocation2 + $0x128] sm:$0x3] %v1827_v20  ;;  %1577 = vmatprep.subr.mxu0 %v1104_v26  ;;  %v552_v54 = vmul.f32 %v2012_v44, %v532_v45  ;;  %v585_v58 = vld [vmem:[#allocation2 + $0xa2] sm:$0xff] }
  0x25   :  { %444 = vst [vmem:[#allocation2 + $0x130] sm:$0xff] %v1827_v20  ;;  %445 = vst [vmem:[#allocation2 + $0x138] sm:$0x3] %v1827_v20  ;;  %1628 = vmatprep.subr.mxu1 %v1104_v26  ;;  %1578 = vmatpush3.msra.mxu0 %v1104_v26  ;;  %v605_v4 = vmul.f32 %v2017_v52, %v585_v58 }
  0x26   :  { %1644 = vmatpush3.msra.mxu1 %v1104_v26  ;;  %1579 = vmatprep.subr.mxu0 %v1103_v27  ;;  %v568_v3 = vadd.f32 %v552_v54, %v507_v47 }
  0x27   :  { %1556 = vmatmul.mubr.msk.f32.gmra.mxu0 %vm68_vm0, %v50_v13  ;;  %1629 = vmatprep.subr.mxu1 %v1103_v27 }
  0x28   :  { %1558 = vmatprep.mubr.msk.f32.mxu0 %vm68_vm0, %v51_v14  ;;  %1580 = vmatpush3.msra.mxu0 %v1103_v27  ;;  %v2027_v14 = vadd.f32 %v597_v0, %v560_v60  ;;  %v2034_v20 = vadd.f32 %v605_v4, %v568_v3 }
  0x29   :  { %1645 = vmatpush3.msra.mxu1 %v1103_v27  ;;  %1581 = vmatprep.subr.mxu0 %v1102_v28 }
  0x2a   :  { %1630 = vmatprep.subr.mxu1 %v1102_v28  ;;  %1582 = vmatpush3.msra.mxu0 %v1102_v28 }
  0x2b   :  { %1559 = vmatmul.mubr.msk.f32.gmra.mxu0 %vm68_vm0, %v52_v15  ;;  %1646 = vmatpush3.msra.mxu1 %v1102_v28 }
  0x2c   :  { %1561 = vmatprep.mubr.msk.f32.mxu0 %vm68_vm0, %v53_v16  ;;  %1583 = vmatprep.subr.mxu0 %v1101_v29 }
  0x2d   :  { %1631 = vmatprep.subr.mxu1 %v1101_v29  ;;  %1584 = vmatpush3.msra.mxu0 %v1101_v29 }
  0x2e   :  { %1647 = vmatpush3.msra.mxu1 %v1101_v29  ;;  %1585 = vmatprep.subr.mxu0 %v1100_v30  ;;  %v2044_v29 = vld [vmem:[#allocation3 + $0x9] ss:$0 sm:$0xff] }
  0x2f   :  { %1562 = vmatmul.mubr.msk.f32.gmra.mxu0 %vm68_vm0, %v54_v17  ;;  %1632 = vmatprep.subr.mxu1 %v1100_v30 }
  0x30   :  { %1564 = vmatprep.mubr.msk.f32.mxu0 %vm68_vm0, %v55_v18  ;;  %1586 = vmatpush3.msra.mxu0 %v1100_v30 }
  0x31   :  { %1648 = vmatpush3.msra.mxu1 %v1100_v30  ;;  %1587 = vmatprep.subr.mxu0 %v1099_v31  ;;  %v2047_v30 = vmul.f32 0.0, %v2039_v24 }
  0x32   :  { %1633 = vmatprep.subr.mxu1 %v1099_v31  ;;  %1588 = vmatpush3.msra.mxu0 %v1099_v31 }
  0x33   :  { %1565 = vmatmul.mubr.msk.f32.gmra.mxu0 %vm68_vm0, %v56_v19  ;;  %1649 = vmatpush3.msra.mxu1 %v1099_v31  ;;  %v852_v19 = vld [vmem:[#allocation2 + $0x91] sm:$0xff] }
  0x34   :  { %1589 = vmatprep.subr.mxu0 %v1098_v32  ;;  %1634 = vmatprep.subr.mxu1 %v1098_v32 }
  0x35   :  { %1590 = vmatpush3.msra.mxu0 %v1098_v32  ;;  %1650 = vmatpush3.msra.mxu1 %v1098_v32 }
  0x36   :  { %1591 = vmatprep.subr.mxu0 %v1097_v33  ;;  %1635 = vmatprep.subr.mxu1 %v1097_v33 }
  0x37   :  { %1592 = vmatpush3.msra.mxu0 %v1097_v33  ;;  %1651 = vmatpush3.msra.mxu1 %v1097_v33  ;;  %v2052_v33 = vmul.f32 %v2044_v29, %v852_v19 }
  0x38   :  { %1593 = vmatprep.subr.mxu0 %v1096_v34  ;;  %1636 = vmatprep.subr.mxu1 %v1096_v34 }
  0x39   :  { %1594 = vmatpush3.msra.mxu0 %v1096_v34  ;;  %1652 = vmatpush3.msra.mxu1 %v1096_v34 }
  0x3a   :  { %1595 = vmatprep.subr.mxu0 %v1095_v35  ;;  %1637 = vmatprep.subr.mxu1 %v1095_v35 }
  0x3b   :  { %1596 = vmatpush3.msra.mxu0 %v1095_v35  ;;  %1653 = vmatpush3.msra.mxu1 %v1095_v35 }
  0x3c   :  { %1597 = vmatprep.subr.mxu0 %v1094_v36  ;;  %1638 = vmatprep.subr.mxu1 %v1094_v36 }
  0x3d   :  { %1598 = vmatpush3.msra.mxu0 %v1094_v36  ;;  %1654 = vmatpush3.msra.mxu1 %v1094_v36 }
  0xd7   :  { %v1545_v42 = vpop.f32.mrf.mxu0 }
  0xd8   :  { %v189_v43 = vadd.f32 %v1545_v42, %v2003_v38 }
  0xd9   :  { %v183_v46 = vpop.f32.mrf.mxu0 }
  0xda   :  { %v279_v49 = vmul.f32 %v189_v43, %v189_v43  ;;  %v184_v50 = vadd.f32 %v2003_v38, %v183_v46  ;;  %v263_v42 = vmul.f32 0.5, %v189_v43 }
  0xdb   :  { %v1548_v51 = vpop.f32.mrf.mxu0 }
  0xdc   :  { %v295_v55 = vmul.f32 %v279_v49, %v189_v43  ;;  %v278_v56 = vmul.f32 %v184_v50, %v184_v50  ;;  %v199_v57 = vadd.f32 %v1548_v51, %v2003_v38  ;;  %v2062_v47 = vmul.f32 0.5, %v184_v50 }
  0xdd   :  { %v193_v59 = vpop.f32.mrf.mxu0 }
  0xde   :  { %v311_v61 = vmul.f32 0.044715, %v295_v55  ;;  %v294_v62 = vmul.f32 %v278_v56, %v184_v50  ;;  %v281_v63 = vmul.f32 %v199_v57, %v199_v57  ;;  %v194_v1 = vadd.f32 %v2003_v38, %v193_v59 }
  0xdf   :  { %v1551_v2 = vpop.f32.mrf.mxu0  ;;  %v2065_v54 = vmul.f32 0.5, %v199_v57 }
  0xe0   :  { %v327_v5 = vadd.f32 %v311_v61, %v189_v43  ;;  %v310_v6 = vmul.f32 0.044715, %v294_v62  ;;  %v297_v7 = vmul.f32 %v281_v63, %v199_v57  ;;  %v2025_v8 = vadd.f32 %v1551_v2, %v2003_v38 }
  0xe1   :  { %v280_v9 = vmul.f32 %v194_v1, %v194_v1  ;;  %v203_v10 = vpop.f32.mrf.mxu0  ;;  %v2081_v0 = vmul.f32 0.5, %v194_v1 }
  0xe2   :  { %v343_v11 = vmul.f32 0.7978846, %v327_v5  ;;  %v326_v12 = vadd.f32 %v310_v6, %v184_v50  ;;  %v313_v13 = vmul.f32 0.044715, %v297_v7  ;;  %v283_v16 = vmul.f32 %v2025_v8, %v2025_v8 }
  0xe3   :  { %v296_v15 = vmul.f32 %v280_v9, %v194_v1  ;;  %v2032_v17 = vadd.f32 %v2003_v38, %v203_v10  ;;  %v1554_v18 = vpop.f32.mrf.mxu0  ;;  %v2088_v10 = vmul.f32 0.5, %v2025_v8 }
  0xe4   :  { %1662 = vtanh.f32 %v343_v11  ;;  %v342_v21 = vmul.f32 0.7978846, %v326_v12  ;;  %v329_v22 = vadd.f32 %v313_v13, %v199_v57  ;;  %v2037_v23 = vadd.f32 %v1554_v18, %v2003_v38 }
  0xe5   :  { %v312_v25 = vmul.f32 0.044715, %v296_v15  ;;  %v299_v26 = vmul.f32 %v283_v16, %v2025_v8  ;;  %v282_v27 = vmul.f32 %v2032_v17, %v2032_v17  ;;  %v213_v28 = vpop.f32.mrf.mxu0  ;;  %v2098_v19 = vmul.f32 0.5, %v2032_v17 }
  0xe6   :  { %1664 = vtanh.f32 %v342_v21  ;;  %v345_v31 = vmul.f32 0.7978846, %v329_v22  ;;  %v285_v32 = vmul.f32 %v2037_v23, %v2037_v23  ;;  %v2056_v39 = vadd.f32 %v2003_v38, %v213_v28 }
  0xe7   :  { %v328_v34 = vadd.f32 %v312_v25, %v194_v1  ;;  %v315_v35 = vmul.f32 0.044715, %v299_v26  ;;  %v298_v36 = vmul.f32 %v282_v27, %v2032_v17  ;;  %v1557_v41 = vpop.f32.mrf.mxu0  ;;  %v2106_v27 = vmul.f32 0.5, %v2037_v23 }
  0xe8   :  { %1666 = vtanh.f32 %v345_v31  ;;  %v301_v45 = vmul.f32 %v285_v32, %v2037_v23  ;;  %v2060_v46 = vadd.f32 %v1557_v41, %v2003_v38  ;;  %v284_v56 = vmul.f32 %v2056_v39, %v2056_v39 }
  0xe9   :  { %v344_v48 = vmul.f32 0.7978846, %v328_v34  ;;  %v331_v49 = vadd.f32 %v315_v35, %v2025_v8  ;;  %v314_v51 = vmul.f32 0.044715, %v298_v36  ;;  %v223_v53 = vpop.f32.mrf.mxu0 }
  0xea   :  { %v317_v55 = vmul.f32 0.044715, %v301_v45  ;;  %v287_v43 = vmul.f32 %v2060_v46, %v2060_v46  ;;  %v2073_v50 = vadd.f32 %v2003_v38, %v223_v53  ;;  %v300_v57 = vmul.f32 %v284_v56, %v2056_v39 }
  0xeb   :  { %1668 = vtanh.f32 %v344_v48  ;;  %v347_v58 = vmul.f32 0.7978846, %v331_v49  ;;  %v330_v59 = vadd.f32 %v314_v51, %v2032_v17  ;;  %v1560_v60 = vpop.f32.mrf.mxu0 }
  0xec   :  { %v333_v61 = vadd.f32 %v317_v55, %v2037_v23  ;;  %v303_v62 = vmul.f32 %v287_v43, %v2060_v46  ;;  %v2079_v63 = vadd.f32 %v1560_v60, %v2003_v38  ;;  %v286_v3 = vmul.f32 %v2073_v50, %v2073_v50 }
  0xed   :  { %1670 = vtanh.f32 %v347_v58  ;;  %v346_v2 = vmul.f32 0.7978846, %v330_v59  ;;  %v233_v4 = vpop.f32.mrf.mxu0  ;;  %v316_v6 = vmul.f32 0.044715, %v300_v57 }
  0xee   :  { %v349_v5 = vmul.f32 0.7978846, %v333_v61  ;;  %v319_v7 = vmul.f32 0.044715, %v303_v62  ;;  %v289_v9 = vmul.f32 %v2079_v63, %v2079_v63  ;;  %v302_v11 = vmul.f32 %v286_v3, %v2073_v50 }
  0xef   :  { %1672 = vtanh.f32 %v346_v2  ;;  %v2092_v1 = vadd.f32 %v2003_v38, %v233_v4  ;;  %v1563_v12 = vpop.f32.mrf.mxu0  ;;  %v332_v13 = vadd.f32 %v316_v6, %v2056_v39 }
  0xf0   :  { %1674 = vtanh.f32 %v349_v5  ;;  %v335_v15 = vadd.f32 %v319_v7, %v2060_v46  ;;  %v305_v16 = vmul.f32 %v289_v9, %v2079_v63  ;;  %v318_v8 = vmul.f32 0.044715, %v302_v11 }
  0xf1   :  { %v1663_v18 = vpop.eup %1662  ;;  %v288_v21 = vmul.f32 %v2092_v1, %v2092_v1  ;;  %v2103_v22 = vadd.f32 %v1563_v12, %v2003_v38  ;;  %v243_v25 = vpop.f32.mrf.mxu0  ;;  %v348_v28 = vmul.f32 0.7978846, %v332_v13  ;;  %v271_v9 = vmul.f32 0.5, %v2060_v46 }
  0xf2   :  { %v375_v26 = vadd.f32 1.0, %v1663_v18  ;;  %v351_v31 = vmul.f32 0.7978846, %v335_v15  ;;  %v334_v34 = vadd.f32 %v318_v8, %v2073_v50  ;;  %v321_v35 = vmul.f32 0.044715, %v305_v16 }
  0xf3   :  { %v1665_v32 = vpop.eup %1664  ;;  %v304_v17 = vmul.f32 %v288_v21, %v2092_v1  ;;  %v244_v36 = vadd.f32 %v2003_v38, %v243_v25  ;;  %v1566_v41 = vpop.f32.mrf.mxu0  ;;  %1676 = vtanh.f32 %v348_v28  ;;  %v291_v49 = vmul.f32 %v2103_v22, %v2103_v22 }
  0xf4   :  { %v2111_v45 = vmul.f32 %v375_v26, %v263_v42  ;;  %v374_v48 = vadd.f32 1.0, %v1665_v32  ;;  %1678 = vtanh.f32 %v351_v31  ;;  %v350_v51 = vmul.f32 0.7978846, %v334_v34  ;;  %v2155_v34 = vld [vmem:[#allocation3 + $0x4] ss:$0 sm:$0xff] }
  0xf5   :  { %v1667_v23 = vpop.eup %1666  ;;  %v337_v53 = vadd.f32 %v321_v35, %v2079_v63  ;;  %v320_v55 = vmul.f32 0.044715, %v304_v17  ;;  %v253_v56 = vpop.f32.mrf.mxu0  ;;  %v2121_v42 = vmul.f32 0.5, %v2056_v39  ;;  %v307_v59 = vmul.f32 %v291_v49, %v2103_v22 }
  0xf6   :  { %448 = vst [vmem:[#allocation2 + $0x21] sm:$0xff] %v2111_v45  ;;  %v2118_v43 = vmul.f32 %v374_v48, %v2062_v47  ;;  %v377_v58 = vadd.f32 1.0, %v1667_v23  ;;  %1680 = vtanh.f32 %v350_v51  ;;  %v290_v57 = vmul.f32 %v244_v36, %v244_v36 }
  0xf7   :  { %v353_v60 = vmul.f32 0.7978846, %v337_v53  ;;  %v336_v61 = vadd.f32 %v320_v55, %v2092_v1  ;;  %v323_v3 = vmul.f32 0.044715, %v307_v59  ;;  %v259_v47 = vadd.f32 %v1566_v41, %v2003_v38  ;;  %v2170_v53 = vld [vmem:[#allocation3 + $0x5] ss:$0 sm:$0xff] }
  0xf8   :  { %v1669_v62 = vpop.eup %1668  ;;  %447 = vst [vmem:[#allocation2 + $0x11] sm:$0xff] %v2118_v43  ;;  %v2127_v2 = vmul.f32 %v377_v58, %v2065_v54  ;;  %v2131_v4 = vadd.f32 %v2003_v38, %v253_v56  ;;  %v306_v6 = vmul.f32 %v290_v57, %v244_v36  ;;  %v2136_v11 = vmul.f32 0.5, %v2073_v50  ;;  %v2181_v57 = vld [vmem:[#allocation3 + $0x6] ss:$0 sm:$0xff] }
  0xf9   :  { %v376_v39 = vadd.f32 1.0, %v1669_v62  ;;  %1682 = vtanh.f32 %v353_v60  ;;  %v352_v5 = vmul.f32 0.7978846, %v336_v61  ;;  %v339_v54 = vadd.f32 %v323_v3, %v2103_v22 }
  0xfa   :  { %v1671_v7 = vpop.eup %1670  ;;  %450 = vst [vmem:[#allocation2 + $0x41] sm:$0xff] %v2127_v2  ;;  %v293_v12 = vmul.f32 %v259_v47, %v259_v47  ;;  %v322_v15 = vmul.f32 0.044715, %v306_v6  ;;  %v2143_v18 = vmul.f32 0.5, %v2079_v63  ;;  %v292_v46 = vmul.f32 %v2131_v4, %v2131_v4 }
  0xfb   :  { %v2140_v13 = vmul.f32 %v376_v39, %v2081_v0  ;;  %v379_v38 = vadd.f32 1.0, %v1671_v7  ;;  %1684 = vtanh.f32 %v352_v5  ;;  %v355_v8 = vmul.f32 0.7978846, %v339_v54 }
  0xfc   :  { %v1673_v16 = vpop.eup %1672  ;;  %v309_v21 = vmul.f32 %v293_v12, %v259_v47  ;;  %v2152_v26 = vmul.f32 0.5, %v2092_v1  ;;  %v338_v28 = vadd.f32 %v322_v15, %v244_v36  ;;  %v308_v32 = vmul.f32 %v292_v46, %v2131_v4  ;;  %v2192_v15 = vld [vmem:[#allocation3 + $0xa] ss:$0 sm:$0xff] }
  0xfd   :  { %v1675_v50 = vpop.eup %1674  ;;  %449 = vst [vmem:[#allocation2 + $0x31] sm:$0xff] %v2140_v13  ;;  %v2149_v25 = vmul.f32 %v379_v38, %v2088_v10  ;;  %v378_v0 = vadd.f32 1.0, %v1673_v16  ;;  %1686 = vtanh.f32 %v355_v8  ;;  %v2162_v10 = vmul.f32 0.5, %v2103_v22  ;;  %v898_v16 = vld [vmem:[#allocation2 + $0x22] sm:$0xff] }
  0xfe   :  { %v381_v31 = vadd.f32 1.0, %v1675_v50  ;;  %v325_v63 = vmul.f32 0.044715, %v309_v21  ;;  %v2164_v17 = vmul.f32 0.5, %v244_v36  ;;  %v354_v1 = vmul.f32 0.7978846, %v338_v28 }
  0xff   :  { %452 = vst [vmem:[#allocation2 + $0x61] sm:$0xff] %v2149_v25  ;;  %v2159_v35 = vmul.f32 %v378_v0, %v2098_v19  ;;  %v631_v41 = vld [vmem:[#allocation2 + $0x10] sm:$0xff]  ;;  %v324_v23 = vmul.f32 0.044715, %v308_v32  ;;  %v2173_v19 = vmul.f32 0.5, %v259_v47  ;;  %v704_v22 = vmul.f32 %v2170_v53, %v2118_v43 }
 0x100   :  { %v2167_v48 = vmul.f32 %v381_v31, %v2106_v27  ;;  %v341_v49 = vadd.f32 %v325_v63, %v259_v47  ;;  %v651_v51 = vmul.f32 %v2155_v34, %v631_v41  ;;  %v737_v55 = vld [vmem:[#allocation2 + $0x12] sm:$0xff]  ;;  %v1677_v56 = vpop.eup %1676  ;;  %1688 = vtanh.f32 %v354_v1  ;;  %v792_v47 = vld [vmem:[#allocation2 + $0x20] sm:$0xff] }
 0x101   :  { %451 = vst [vmem:[#allocation2 + $0x51] sm:$0xff] %v2159_v35  ;;  %v492_v36 = vmul.f32 %v1998_v37, %v631_v41  ;;  %v1679_v27 = vpop.eup %1678  ;;  %v380_v58 = vadd.f32 1.0, %v1677_v56  ;;  %v340_v60 = vadd.f32 %v324_v23, %v2131_v4  ;;  %v757_v3 = vmul.f32 %v2181_v57, %v737_v55 }
 0x102   :  { %454 = vst [vmem:[#allocation2 + $0x81] sm:$0xff] %v2167_v48  ;;  %v357_v59 = vmul.f32 0.7978846, %v341_v49  ;;  %v667_v61 = vadd.f32 %v651_v51, %v2027_v14  ;;  %v383_v62 = vadd.f32 1.0, %v1679_v27  ;;  %v545_v5 = vmul.f32 %v2012_v44, %v2118_v43 }
 0x103   :  { %v508_v39 = vadd.f32 %v2009_v40, %v492_v36  ;;  %v1681_v6 = vpop.eup %1680  ;;  %v2188_v7 = vmul.f32 %v380_v58, %v2121_v42  ;;  %v356_v54 = vmul.f32 0.7978846, %v340_v60  ;;  %v598_v21 = vmul.f32 %v2017_v52, %v737_v55 }
 0x104   :  { %1690 = vtanh.f32 %v357_v59  ;;  %v720_v12 = vadd.f32 %v704_v22, %v667_v61  ;;  %v2190_v38 = vmul.f32 %v383_v62, %v271_v9  ;;  %v382_v14 = vadd.f32 1.0, %v1681_v6  ;;  %v793_v41 = vld [vmem:[#allocation2 + $0x30] sm:$0xff] }
 0x105   :  { %v561_v8 = vadd.f32 %v545_v5, %v508_v39  ;;  %453 = vst [vmem:[#allocation2 + $0x71] sm:$0xff] %v2188_v7  ;;  %v2197_v43 = vmul.f32 0.5, %v2131_v4  ;;  %1692 = vtanh.f32 %v356_v54  ;;  %v812_v50 = vmul.f32 %v2039_v24, %v792_v47  ;;  %v899_v36 = vld [vmem:[#allocation2 + $0x32] sm:$0xff]  ;;  %v794_v54 = vld [vmem:[#allocation2 + $0x40] sm:$0xff] }
 0x106   :  { %v1683_v46 = vpop.eup %1682  ;;  %v773_v42 = vadd.f32 %v757_v3, %v720_v12  ;;  %456 = vst [vmem:[#allocation2 + $0xc1] sm:$0xff] %v2190_v38  ;;  %v2202_v9 = vmul.f32 %v382_v14, %v2136_v11  ;;  %v652_v31 = vmul.f32 %v2155_v34, %v792_v47  ;;  %v865_v1 = vmul.f32 %v2044_v29, %v2111_v45 }
 0x107   :  { %v385_v0 = vadd.f32 1.0, %v1683_v46  ;;  %v614_v28 = vadd.f32 %v598_v21, %v561_v8  ;;  %v918_v4 = vmul.f32 %v2192_v15, %v898_v16  ;;  %v493_v49 = vmul.f32 %v1998_v37, %v792_v47 }
 0x108   :  { %v1685_v63 = vpop.eup %1684  ;;  %v828_v32 = vadd.f32 %v812_v50, %v773_v42  ;;  %455 = vst [vmem:[#allocation2 + $0xb1] sm:$0xff] %v2202_v9  ;;  %v705_v55 = vmul.f32 %v2170_v53, %v2111_v45  ;;  %v758_v22 = vmul.f32 %v2181_v57, %v898_v16  ;;  %v546_v58 = vmul.f32 %v2012_v44, %v2111_v45 }
 0x109   :  { %v401_v23 = vmul.f32 %v385_v0, %v2143_v18  ;;  %v384_v11 = vadd.f32 1.0, %v1685_v63  ;;  %v668_v51 = vadd.f32 %v652_v31, %v614_v28  ;;  %v509_v27 = vadd.f32 %v2009_v40, %v493_v49 }
 0x10a   :  { %v881_v56 = vadd.f32 %v865_v1, %v828_v32  ;;  %v1687_v59 = vpop.eup %1686  ;;  %v813_v61 = vmul.f32 %v2039_v24, %v793_v41  ;;  %v599_v62 = vmul.f32 %v2017_v52, %v898_v16  ;;  %v653_v5 = vmul.f32 %v2155_v34, %v793_v41  ;;  %v900_v1 = vld [vmem:[#allocation2 + $0x42] sm:$0xff] }
 0x10b   :  { %458 = vst [vmem:[#allocation2 + $0xe1] sm:$0xff] %v401_v23  ;;  %v2218_v60 = vmul.f32 %v384_v11, %v2152_v26  ;;  %v721_v18 = vadd.f32 %v705_v55, %v668_v51  ;;  %v387_v3 = vadd.f32 1.0, %v1687_v59  ;;  %v562_v39 = vadd.f32 %v546_v58, %v509_v27 }
 0x10c   :  { %v2222_v47 = vadd.f32 %v918_v4, %v881_v56  ;;  %v866_v45 = vmul.f32 %v2044_v29, %v2140_v13  ;;  %v919_v26 = vmul.f32 %v2192_v15, %v899_v36  ;;  %v494_v12 = vmul.f32 %v1998_v37, %v793_v41 }
 0x10d   :  { %457 = vst [vmem:[#allocation2 + $0xd1] sm:$0xff] %v2218_v60  ;;  %v774_v6 = vadd.f32 %v758_v22, %v721_v18  ;;  %v1689_v14 = vpop.eup %1688  ;;  %v403_v16 = vmul.f32 %v387_v3, %v2162_v10  ;;  %v615_v21 = vadd.f32 %v599_v62, %v562_v39  ;;  %v706_v46 = vmul.f32 %v2170_v53, %v2140_v13 }
 0x10e   :  { %v966_v8 = vmul.f32 %v2222_v47, %v2222_v47  ;;  %v386_v42 = vadd.f32 1.0, %v1689_v14  ;;  %v510_v0 = vadd.f32 %v2009_v40, %v494_v12  ;;  %v547_v28 = vmul.f32 %v2012_v44, %v2140_v13 }
 0x10f   :  { %v829_v50 = vadd.f32 %v813_v61, %v774_v6  ;;  %460 = vst [vmem:[#allocation2 + $0x101] sm:$0xff] %v403_v16  ;;  %v669_v63 = vadd.f32 %v653_v5, %v615_v21  ;;  %v759_v10 = vmul.f32 %v2181_v57, %v899_v36  ;;  %v814_v32 = vmul.f32 %v2039_v24, %v794_v54  ;;  %v795_v6 = vld [vmem:[#allocation2 + $0x50] sm:$0xff] }
 0x110   :  { %v982_v31 = vmul.f32 %v966_v8, %v2222_v47  ;;  %v402_v41 = vmul.f32 %v386_v42, %v2164_v17  ;;  %v563_v23 = vadd.f32 %v547_v28, %v510_v0  ;;  %v600_v11 = vmul.f32 %v2017_v52, %v899_v36  ;;  %v2254_v21 = vld [vmem:[#allocation2 + $0x52] sm:$0xff]  ;;  %v796_v0 = vld [vmem:[#allocation2 + $0x60] sm:$0xff] }
 0x111   :  { %v1691_v4 = vpop.eup %1690  ;;  %v882_v49 = vadd.f32 %v866_v45, %v829_v50  ;;  %v722_v56 = vadd.f32 %v706_v46, %v669_v63  ;;  %v867_v13 = vmul.f32 %v2044_v29, %v2127_v2  ;;  %v920_v58 = vmul.f32 %v2192_v15, %v900_v1 }
 0x112   :  { %v389_v51 = vadd.f32 1.0, %v1691_v4  ;;  %v998_v55 = vmul.f32 0.044715, %v982_v31  ;;  %v1693_v22 = vpop.eup %1692  ;;  %459 = vst [vmem:[#allocation2 + $0xf1] sm:$0xff] %v402_v41  ;;  %v616_v59 = vadd.f32 %v600_v11, %v563_v23  ;;  %v654_v18 = vmul.f32 %v2155_v34, %v794_v54 }
 0x113   :  { %v935_v27 = vadd.f32 %v919_v26, %v882_v49  ;;  %v388_v61 = vadd.f32 1.0, %v1693_v22  ;;  %v775_v36 = vadd.f32 %v759_v10, %v722_v56  ;;  %v707_v5 = vmul.f32 %v2170_v53, %v2127_v2 }
 0x114   :  { %v405_v17 = vmul.f32 %v389_v51, %v2173_v19  ;;  %v1014_v62 = vadd.f32 %v998_v55, %v2222_v47  ;;  %v670_v39 = vadd.f32 %v654_v18, %v616_v59  ;;  %v495_v45 = vmul.f32 %v1998_v37, %v794_v54  ;;  %v637_v55 = vld [vmem:[#allocation2 + $0x70] sm:$0xff] }
 0x115   :  { %v967_v3 = vmul.f32 %v935_v27, %v935_v27  ;;  %v404_v26 = vmul.f32 %v388_v61, %v2197_v43  ;;  %v830_v14 = vadd.f32 %v814_v32, %v775_v36  ;;  %v760_v16 = vmul.f32 %v2181_v57, %v900_v1 }
 0x116   :  { %462 = vst [vmem:[#allocation2 + $0x121] sm:$0xff] %v405_v17  ;;  %v1030_v12 = vmul.f32 0.7978846, %v1014_v62  ;;  %v723_v8 = vadd.f32 %v707_v5, %v670_v39  ;;  %v511_v46 = vadd.f32 %v2009_v40, %v495_v45  ;;  %v548_v42 = vmul.f32 %v2012_v44, %v2127_v2  ;;  %v743_v45 = vld [vmem:[#allocation2 + $0x72] sm:$0xff] }
 0x117   :  { %v983_v19 = vmul.f32 %v967_v3, %v935_v27  ;;  %461 = vst [vmem:[#allocation2 + $0x111] sm:$0xff] %v404_v26  ;;  %v883_v50 = vadd.f32 %v867_v13, %v830_v14  ;;  %v815_v54 = vmul.f32 %v2039_v24, %v795_v6  ;;  %v601_v43 = vmul.f32 %v2017_v52, %v900_v1  ;;  %v902_v1 = vld [vmem:[#allocation2 + $0x62] sm:$0xff] }
 0x118   :  { %1694 = vtanh.f32 %v1030_v12  ;;  %v776_v31 = vadd.f32 %v760_v16, %v723_v8  ;;  %v564_v63 = vadd.f32 %v548_v42, %v511_v46  ;;  %v655_v10 = vmul.f32 %v2155_v34, %v795_v6  ;;  %v798_v26 = vld [vmem:[#allocation2 + $0x80] sm:$0xff] }
 0x119   :  { %v999_v28 = vmul.f32 0.044715, %v983_v19  ;;  %v950_v32 = vmul.f32 0.5, %v2222_v47  ;;  %v2263_v4 = vadd.f32 %v920_v58, %v883_v50  ;;  %v868_v2 = vmul.f32 %v2044_v29, %v2159_v35 }
 0x11a   :  { %v921_v41 = vmul.f32 %v2192_v15, %v2254_v21  ;;  %v831_v23 = vadd.f32 %v815_v54, %v776_v31  ;;  %v617_v11 = vadd.f32 %v601_v43, %v564_v63  ;;  %v497_v51 = vmul.f32 %v1998_v37, %v796_v0  ;;  %v2294_v54 = vld [vmem:[#allocation2 + $0x82] sm:$0xff] }
 0x11b   :  { %v1015_v49 = vadd.f32 %v999_v28, %v935_v27  ;;  %v2270_v56 = vmul.f32 0.5, %v935_v27  ;;  %v968_v47 = vmul.f32 %v2263_v4, %v2263_v4  ;;  %v708_v13 = vmul.f32 %v2170_v53, %v2159_v35 }
 0x11c   :  { %v550_v22 = vmul.f32 %v2012_v44, %v2149_v25  ;;  %v884_v59 = vadd.f32 %v868_v2, %v831_v23  ;;  %v671_v18 = vadd.f32 %v655_v10, %v617_v11  ;;  %v513_v17 = vadd.f32 %v2009_v40, %v497_v51 }
 0x11d   :  { %v1031_v58 = vmul.f32 0.7978846, %v1015_v49  ;;  %v984_v61 = vmul.f32 %v968_v47, %v2263_v4  ;;  %v761_v27 = vmul.f32 %v2181_v57, %v2254_v21  ;;  %v603_v62 = vmul.f32 %v2017_v52, %v902_v1 }
 0x11e   :  { %v657_v36 = vmul.f32 %v2155_v34, %v637_v55  ;;  %v2284_v3 = vadd.f32 %v921_v41, %v884_v59  ;;  %v724_v39 = vadd.f32 %v708_v13, %v671_v18  ;;  %v566_v5 = vadd.f32 %v550_v22, %v513_v17 }
 0x11f   :  { %1696 = vtanh.f32 %v1031_v58  ;;  %v1000_v12 = vmul.f32 0.044715, %v984_v61  ;;  %v816_v14 = vmul.f32 %v2039_v24, %v796_v0  ;;  %v869_v16 = vmul.f32 %v2044_v29, %v2149_v25 }
 0x120   :  { %v922_v19 = vmul.f32 %v2192_v15, %v902_v1  ;;  %v969_v8 = vmul.f32 %v2284_v3, %v2284_v3  ;;  %v777_v46 = vadd.f32 %v761_v27, %v724_v39  ;;  %v619_v42 = vadd.f32 %v603_v62, %v566_v5 }
 0x121   :  { %v710_v50 = vmul.f32 %v2170_v53, %v2188_v7  ;;  %v1016_v43 = vadd.f32 %v1000_v12, %v2263_v4  ;;  %v763_v28 = vmul.f32 %v2181_v57, %v743_v45  ;;  %v818_v31 = vmul.f32 %v2039_v24, %v798_v26 }
 0x122   :  { %v496_v63 = vmul.f32 %v1998_v37, %v795_v6  ;;  %v985_v10 = vmul.f32 %v969_v8, %v2284_v3  ;;  %v832_v2 = vadd.f32 %v816_v14, %v777_v46  ;;  %v673_v41 = vadd.f32 %v657_v36, %v619_v42  ;;  %v639_v46 = vld [vmem:[#allocation2 + $0xb0] sm:$0xff] }
 0x123   :  { %v871_v49 = vmul.f32 %v2044_v29, %v2167_v48  ;;  %v1032_v23 = vmul.f32 0.7978846, %v1016_v43  ;;  %v924_v11 = vmul.f32 %v2192_v15, %v2294_v54  ;;  %v549_v47 = vmul.f32 %v2012_v44, %v2159_v35 }
 0x124   :  { %v512_v51 = vadd.f32 %v2009_v40, %v496_v63  ;;  %v1001_v22 = vmul.f32 0.044715, %v985_v10  ;;  %v885_v58 = vadd.f32 %v869_v16, %v832_v2  ;;  %v726_v6 = vadd.f32 %v710_v50, %v673_v41 }
 0x125   :  { %v1695_v13 = vpop.eup %1694  ;;  %v602_v59 = vmul.f32 %v2017_v52, %v2254_v21  ;;  %1698 = vtanh.f32 %v1032_v23  ;;  %v656_v61 = vmul.f32 %v2155_v34, %v796_v0  ;;  %v709_v35 = vmul.f32 %v2170_v53, %v2149_v25 }
 0x126   :  { %v1062_v18 = vadd.f32 1.0, %v1695_v13  ;;  %v565_v17 = vadd.f32 %v549_v47, %v512_v51  ;;  %v1017_v27 = vadd.f32 %v1001_v22, %v2284_v3  ;;  %v2312_v62 = vadd.f32 %v922_v19, %v885_v58  ;;  %v800_v58 = vld [vmem:[#allocation2 + $0xc0] sm:$0xff] }
 0x127   :  { %v779_v36 = vadd.f32 %v763_v28, %v726_v6  ;;  %v762_v12 = vmul.f32 %v2181_v57, %v902_v1  ;;  %v498_v14 = vmul.f32 %v1998_v37, %v637_v55  ;;  %v817_v0 = vmul.f32 %v2039_v24, %v637_v55 }
 0x128   :  { %v1078_v39 = vmul.f32 %v1062_v18, %v950_v32  ;;  %v618_v5 = vadd.f32 %v602_v59, %v565_v17  ;;  %v1033_v21 = vmul.f32 0.7978846, %v1017_v27  ;;  %v970_v16 = vmul.f32 %v2312_v62, %v2312_v62  ;;  %v905_v17 = vld [vmem:[#allocation2 + $0x92] sm:$0xff] }
 0x129   :  { %v834_v8 = vadd.f32 %v818_v31, %v779_v36  ;;  %v870_v42 = vmul.f32 %v2044_v29, %v2188_v7  ;;  %v514_v25 = vadd.f32 %v2009_v40, %v498_v14  ;;  %v551_v32 = vmul.f32 %v2012_v44, %v2188_v7  ;;  %v745_v7 = vld [vmem:[#allocation2 + $0xb2] sm:$0xff] }
 0x12a   :  { %1599 = vmatprep.mubr.f32.mxu0 %v1078_v39  ;;  %v672_v19 = vadd.f32 %v656_v61, %v618_v5  ;;  %1700 = vtanh.f32 %v1033_v21  ;;  %v986_v1 = vmul.f32 %v970_v16, %v2312_v62  ;;  %v923_v43 = vmul.f32 %v2192_v15, %v743_v45 }
 0x12b   :  { %v887_v50 = vadd.f32 %v871_v49, %v834_v8  ;;  %v567_v55 = vadd.f32 %v551_v32, %v514_v25  ;;  %v604_v63 = vmul.f32 %v2017_v52, %v743_v45  ;;  %v659_v10 = vmul.f32 %v2155_v34, %v639_v46 }
 0x12c   :  { %v1697_v28 = vpop.eup %1696  ;;  %v725_v31 = vadd.f32 %v709_v35, %v672_v19  ;;  %v1002_v41 = vmul.f32 0.044715, %v986_v1  ;;  %v658_v51 = vmul.f32 %v2155_v34, %v798_v26  ;;  %v712_v22 = vmul.f32 %v2170_v53, %v2202_v9 }
 0x12d   :  { %v1063_v2 = vadd.f32 1.0, %v1697_v28  ;;  %v2330_v23 = vadd.f32 %v924_v11, %v887_v50  ;;  %v620_v13 = vadd.f32 %v604_v63, %v567_v55  ;;  %v675_v49 = vadd.f32 %v659_v10, %v2034_v20 }
 0x12e   :  { %v778_v47 = vadd.f32 %v762_v12, %v725_v31  ;;  %v1018_v45 = vadd.f32 %v1002_v41, %v2312_v62  ;;  %v711_v11 = vmul.f32 %v2170_v53, %v2167_v48  ;;  %v765_v20 = vmul.f32 %v2181_v57, %v745_v7 }
 0x12f   :  { %v1079_v6 = vmul.f32 %v1063_v2, %v2270_v56  ;;  %v972_v59 = vmul.f32 %v2330_v23, %v2330_v23  ;;  %v674_v18 = vadd.f32 %v658_v51, %v620_v13  ;;  %v728_v61 = vadd.f32 %v712_v22, %v675_v49  ;;  %v693_v13 = vld [vmem:[#allocation2 + $0xc1] sm:$0xff] }
 0x130   :  { %v833_v26 = vadd.f32 %v817_v0, %v778_v47  ;;  %v1034_v27 = vmul.f32 0.7978846, %v1018_v45  ;;  %v764_v56 = vmul.f32 %v2181_v57, %v2294_v54  ;;  %v820_v35 = vmul.f32 %v2039_v24, %v800_v58  ;;  %v906_v0 = vld [vmem:[#allocation2 + $0xc2] sm:$0xff] }
 0x131   :  { %1600 = vmatmul.mubr.f32.vlgmr.msra.gmra.mxu0 %v1079_v6  ;;  %v988_v36 = vmul.f32 %v972_v59, %v2330_v23  ;;  %v727_v5 = vadd.f32 %v711_v11, %v674_v18  ;;  %v781_v12 = vadd.f32 %v765_v20, %v728_v61  ;;  %v500_v48 = vmul.f32 %v1998_v37, %v639_v46 }
 0x132   :  { %v886_v39 = vadd.f32 %v870_v42, %v833_v26  ;;  %v1699_v14 = vpop.eup %1698  ;;  %v952_v21 = vmul.f32 0.5, %v2263_v4  ;;  %1702 = vtanh.f32 %v1034_v27  ;;  %v925_v8 = vmul.f32 %v2192_v15, %v905_v17  ;;  %v801_v17 = vld [vmem:[#allocation2 + $0xd0] sm:$0xff] }
 0x133   :  { %v1004_v16 = vmul.f32 0.044715, %v988_v36  ;;  %v1064_v19 = vadd.f32 1.0, %v1699_v14  ;;  %v780_v32 = vadd.f32 %v764_v56, %v727_v5  ;;  %v836_v54 = vadd.f32 %v820_v35, %v781_v12 }
 0x134   :  { %v2350_v25 = vadd.f32 %v923_v43, %v886_v39  ;;  %v873_v42 = vmul.f32 %v2044_v29, %v2190_v38  ;;  %v516_v46 = vadd.f32 %v2009_v40, %v500_v48  ;;  %v553_v4 = vmul.f32 %v2012_v44, %v2202_v9 }
 0x135   :  { %v1020_v1 = vadd.f32 %v1004_v16, %v2330_v23  ;;  %v1080_v50 = vmul.f32 %v1064_v19, %v952_v21  ;;  %v835_v31 = vadd.f32 %v2047_v30, %v780_v32  ;;  %v926_v43 = vmul.f32 %v2192_v15, %v906_v0  ;;  %v907_v21 = vld [vmem:[#allocation2 + $0xd2] sm:$0xff] }
 0x136   :  { %v971_v28 = vmul.f32 %v2350_v25, %v2350_v25  ;;  %v889_v63 = vadd.f32 %v873_v42, %v836_v54  ;;  %v569_v10 = vadd.f32 %v553_v4, %v516_v46  ;;  %v606_v2 = vmul.f32 %v2017_v52, %v745_v7 }
 0x137   :  { %v1036_v55 = vmul.f32 0.7978846, %v1020_v1  ;;  %v1701_v41 = vpop.eup %1700  ;;  %1602 = vmatprep.mubr.f32.mxu0 %v1080_v50  ;;  %v953_v38 = vmul.f32 0.5, %v2284_v3  ;;  %v888_v9 = vadd.f32 %v2052_v33, %v835_v31  ;;  %v660_v47 = vmul.f32 %v2155_v34, %v800_v58 }
 0x138   :  { %v987_v51 = vmul.f32 %v971_v28, %v2350_v25  ;;  %v1065_v49 = vadd.f32 1.0, %v1701_v41  ;;  %v942_v22 = vadd.f32 %v926_v43, %v889_v63  ;;  %v622_v6 = vadd.f32 %v606_v2, %v569_v10  ;;  %v2393_v41 = vld [vmem:[%s2613_s4] ss:$0 sm:$0xff] }
 0x139   :  { %1704 = vtanh.f32 %v1036_v55  ;;  %v2367_v59 = vadd.f32 %v925_v8, %v888_v9  ;;  %v501_v7 = vmul.f32 %v1998_v37, %v800_v58  ;;  %v713_v3 = vmul.f32 %v2170_v53, %v693_v13  ;;  %v694_v8 = vld [vmem:[#allocation2 + $0xd1] sm:$0xff] }
 0x13a   :  { %v1003_v45 = vmul.f32 0.044715, %v987_v51  ;;  %v1081_v11 = vmul.f32 %v1065_v49, %v953_v38  ;;  %v974_v26 = vmul.f32 %v942_v22, %v942_v22  ;;  %v676_v18 = vadd.f32 %v660_v47, %v622_v6  ;;  %v855_v49 = vld [vmem:[#allocation2 + $0xe1] sm:$0xff] }
 0x13b   :  { %v954_v33 = vmul.f32 0.5, %v2312_v62  ;;  %v973_v20 = vmul.f32 %v2367_v59, %v2367_v59  ;;  %v517_v27 = vadd.f32 %v2009_v40, %v501_v7  ;;  %v766_v58 = vmul.f32 %v2181_v57, %v906_v0 }
 0x13c   :  { %v1019_v61 = vadd.f32 %v1003_v45, %v2350_v25  ;;  %1603 = vmatmul.mubr.f32.gmra.mxu0 %v1081_v11  ;;  %v990_v36 = vmul.f32 %v974_v26, %v942_v22  ;;  %v729_v56 = vadd.f32 %v713_v3, %v676_v18  ;;  %v554_v35 = vmul.f32 %v2012_v44, %v693_v13  ;;  %v2402_v45 = vld [vmem:[#allocation3 + $0x2] ss:$0 sm:$0xff] }
 0x13d   :  { %v989_v5 = vmul.f32 %v973_v20, %v2367_v59  ;;  %v821_v12 = vmul.f32 %v2039_v24, %v801_v17  ;;  %v607_v62 = vmul.f32 %v2017_v52, %v906_v0  ;;  %v661_v40 = vmul.f32 %v2155_v34, %v801_v17 }
 0x13e   :  { %v1035_v39 = vmul.f32 0.7978846, %v1019_v61  ;;  %v1006_v48 = vmul.f32 0.044715, %v990_v36  ;;  %v782_v14 = vadd.f32 %v766_v58, %v729_v56  ;;  %v570_v16 = vadd.f32 %v554_v35, %v517_v27  ;;  %v2412_v61 = vld [vmem:[#allocation3] ss:$0 sm:$0xff] }
 0x13f   :  { %v1703_v19 = vpop.eup %1702  ;;  %v956_v32 = vmul.f32 0.5, %v2330_v23  ;;  %v1005_v54 = vmul.f32 0.044715, %v989_v5  ;;  %v874_v1 = vmul.f32 %v2044_v29, %v2218_v60  ;;  %v927_v0 = vmul.f32 %v2192_v15, %v907_v21  ;;  %v802_v60 = vld [vmem:[#allocation2 + $0xe0] sm:$0xff]  ;;  %v803_v35 = vld [vmem:[#allocation2 + $0xf0] sm:$0xff] }
 0x140   :  { %1706 = vtanh.f32 %v1035_v39  ;;  %v1066_v42 = vadd.f32 1.0, %v1703_v19  ;;  %v1022_v46 = vadd.f32 %v1006_v48, %v942_v22  ;;  %v837_v4 = vadd.f32 %v821_v12, %v782_v14  ;;  %v2419_v12 = vld [vmem:[#allocation3 + $0x1] ss:$0 sm:$0xff] }
 0x141   :  { %v623_v50 = vadd.f32 %v607_v62, %v570_v16  ;;  %v1021_v52 = vadd.f32 %v1005_v54, %v2367_v59  ;;  %v714_v28 = vmul.f32 %v2170_v53, %v694_v8  ;;  %v502_v31 = vmul.f32 %v1998_v37, %v801_v17  ;;  %v908_v17 = vld [vmem:[#allocation2 + $0xe2] sm:$0xff] }
 0x142   :  { %v1082_v43 = vmul.f32 %v1066_v42, %v954_v33  ;;  %v1038_v55 = vmul.f32 0.7978846, %v1022_v46  ;;  %v890_v23 = vadd.f32 %v874_v1, %v837_v4  ;;  %v955_v10 = vmul.f32 0.5, %v2350_v25 }
 0x143   :  { %v677_v63 = vadd.f32 %v661_v40, %v623_v50  ;;  %v1037_v2 = vmul.f32 0.7978846, %v1021_v52  ;;  %v518_v38 = vadd.f32 %v2393_v41, %v502_v31  ;;  %v555_v51 = vmul.f32 %v2012_v44, %v694_v8  ;;  %v856_v40 = vld [vmem:[#allocation2 + $0xf1] sm:$0xff] }
 0x144   :  { %1605 = vmatprep.mubr.f32.mxu0 %v1082_v43  ;;  %1708 = vtanh.f32 %v1038_v55  ;;  %v2397_v37 = vadd.f32 %v927_v0, %v890_v23  ;;  %v767_v47 = vmul.f32 %v2181_v57, %v907_v21  ;;  %v2400_v25 = vmul.f32 0.5, %v942_v22  ;;  %v909_v31 = vld [vmem:[#allocation2 + $0xf2] sm:$0xff] }
 0x145   :  { %v730_v9 = vadd.f32 %v714_v28, %v677_v63  ;;  %1710 = vtanh.f32 %v1037_v2  ;;  %v571_v6 = vadd.f32 %v555_v51, %v518_v38  ;;  %v608_v7 = vmul.f32 %v2402_v45, %v907_v21 }
 0x146   :  { %v1705_v13 = vpop.eup %1704  ;;  %v975_v44 = vmul.f32 %v2397_v37, %v2397_v37  ;;  %v822_v18 = vmul.f32 %v2039_v24, %v802_v60  ;;  %v2409_v3 = vmul.f32 0.5, %v2367_v59  ;;  %v662_v22 = vmul.f32 %v2155_v34, %v802_v60 }
 0x147   :  { %v1068_v11 = vadd.f32 1.0, %v1705_v13  ;;  %v783_v26 = vadd.f32 %v767_v47, %v730_v9  ;;  %v624_v33 = vadd.f32 %v608_v7, %v571_v6  ;;  %v503_v20 = vmul.f32 %v2412_v61, %v802_v60  ;;  %v804_v9 = vld [vmem:[#allocation2 + $0x100] sm:$0xff] }
 0x148   :  { %v991_v36 = vmul.f32 %v975_v44, %v2397_v37  ;;  %v875_v58 = vmul.f32 %v2044_v29, %v855_v49  ;;  %v715_v5 = vmul.f32 %v2170_v53, %v855_v49  ;;  %v556_v62 = vmul.f32 %v2419_v12, %v855_v49 }
 0x149   :  { %v1084_v27 = vmul.f32 %v1068_v11, %v956_v32  ;;  %v838_v56 = vadd.f32 %v822_v18, %v783_v26  ;;  %v678_v39 = vadd.f32 %v662_v22, %v624_v33  ;;  %v519_v59 = vadd.f32 %v2393_v41, %v503_v20  ;;  %v910_v33 = vld [vmem:[#allocation2 + $0x102] sm:$0xff] }
 0x14a   :  { %v1007_v48 = vmul.f32 0.044715, %v991_v36  ;;  %v928_v21 = vmul.f32 %v2192_v15, %v908_v17  ;;  %v768_v16 = vmul.f32 %v2181_v57, %v908_v17  ;;  %v609_v32 = vmul.f32 %v2402_v45, %v908_v17 }
 0x14b   :  { %1608 = vmatprep.mubr.f32.mxu1 %v1084_v27  ;;  %v891_v14 = vadd.f32 %v875_v58, %v838_v56  ;;  %v731_v8 = vadd.f32 %v715_v5, %v678_v39  ;;  %v572_v19 = vadd.f32 %v556_v62, %v519_v59  ;;  %v663_v54 = vmul.f32 %v2155_v34, %v803_v35  ;;  %v2444_v58 = vld [vmem:[#allocation3 + $0x8] ss:$0 sm:$0xff]  ;;  %v2448_v5 = vld [vmem:[#allocation3 + $0x9] ss:$0 sm:$0xff] }
 0x14c   :  { %v1023_v42 = vadd.f32 %v1007_v48, %v2397_v37  ;;  %v823_v4 = vmul.f32 %v2039_v24, %v803_v35  ;;  %v504_v50 = vmul.f32 %v2412_v61, %v803_v35  ;;  %v876_v28 = vmul.f32 %v2044_v29, %v856_v40 }
 0x14d   :  { %v1707_v1 = vpop.eup %1706  ;;  %v2427_v46 = vadd.f32 %v928_v21, %v891_v14  ;;  %v784_v0 = vadd.f32 %v768_v16, %v731_v8  ;;  %v625_v43 = vadd.f32 %v609_v32, %v572_v19  ;;  %v557_v2 = vmul.f32 %v2419_v12, %v856_v40  ;;  %v805_v14 = vld [vmem:[#allocation2 + $0x110] sm:$0xff] }
 0x14e   :  { %v1067_v52 = vadd.f32 1.0, %v1707_v1  ;;  %v1039_v55 = vmul.f32 0.7978846, %v1023_v42  ;;  %v520_v63 = vadd.f32 %v2393_v41, %v504_v50  ;;  %v716_v24 = vmul.f32 %v2170_v53, %v856_v40  ;;  %v858_v1 = vld [vmem:[#allocation2 + $0x111] sm:$0xff] }
 0x14f   :  { %v976_v23 = vmul.f32 %v2427_v46, %v2427_v46  ;;  %v839_v38 = vadd.f32 %v823_v4, %v784_v0  ;;  %v679_v51 = vadd.f32 %v663_v54, %v625_v43  ;;  %v610_v13 = vmul.f32 %v2402_v45, %v909_v31 }
 0x150   :  { %v1083_v60 = vmul.f32 %v1067_v52, %v955_v10  ;;  %1712 = vtanh.f32 %v1039_v55  ;;  %v573_v29 = vadd.f32 %v557_v2, %v520_v63  ;;  %v929_v7 = vmul.f32 %v2192_v15, %v909_v31  ;;  %v857_v10 = vld [vmem:[#allocation2 + $0x101] sm:$0xff] }
 0x151   :  { %v992_v47 = vmul.f32 %v976_v23, %v2427_v46  ;;  %v1709_v49 = vpop.eup %1708  ;;  %v892_v6 = vadd.f32 %v876_v28, %v839_v38  ;;  %v732_v11 = vadd.f32 %v716_v24, %v679_v51  ;;  %v769_v44 = vmul.f32 %v2181_v57, %v909_v31  ;;  %v911_v23 = vld [vmem:[#allocation2 + $0x112] sm:$0xff] }
 0x152   :  { %1606 = vmatmul.mubr.f32.gmra.mxu0 %v1083_v60  ;;  %v1711_v26 = vpop.eup %1710  ;;  %v1070_v18 = vadd.f32 1.0, %v1709_v49  ;;  %v626_v22 = vadd.f32 %v610_v13, %v573_v29  ;;  %v664_v20 = vmul.f32 %v2155_v34, %v804_v9  ;;  %v824_v35 = vmul.f32 %v2444_v58, %v804_v9 }
 0x153   :  { %v1008_v17 = vmul.f32 0.044715, %v992_v47  ;;  %v1069_v27 = vadd.f32 1.0, %v1711_v26  ;;  %v2442_v36 = vadd.f32 %v929_v7, %v892_v6  ;;  %v785_v56 = vadd.f32 %v769_v44, %v732_v11 }
 0x154   :  { %v877_v59 = vmul.f32 %v2448_v5, %v857_v10  ;;  %v680_v62 = vadd.f32 %v664_v20, %v626_v22  ;;  %v717_v48 = vmul.f32 %v2170_v53, %v857_v10  ;;  %v770_v8 = vmul.f32 %v2181_v57, %v910_v33 }
 0x155   :  { %v1024_v39 = vadd.f32 %v1008_v17, %v2427_v46  ;;  %v1085_v21 = vmul.f32 %v1069_v27, %v2409_v3  ;;  %v977_v16 = vmul.f32 %v2442_v36, %v2442_v36  ;;  %v840_v40 = vadd.f32 %v824_v35, %v785_v56 }
 0x156   :  { %v1086_v19 = vmul.f32 %v1070_v18, %v2400_v25  ;;  %v733_v54 = vadd.f32 %v717_v48, %v680_v62  ;;  %v505_v42 = vmul.f32 %v2412_v61, %v804_v9  ;;  %v930_v52 = vmul.f32 %v2192_v15, %v910_v33 }
 0x157   :  { %v1040_v32 = vmul.f32 0.7978846, %v1024_v39  ;;  %1609 = vmatmul.mubr.f32.vlgmr.msra.gmra.mxu1 %v1085_v21  ;;  %v993_v4 = vmul.f32 %v977_v16, %v2442_v36  ;;  %v893_v50 = vadd.f32 %v877_v59, %v840_v40  ;;  %v825_v3 = vmul.f32 %v2444_v58, %v805_v14 }
 0x158   :  { %1611 = vmatprep.mubr.f32.mxu1 %v1086_v19  ;;  %v786_v0 = vadd.f32 %v770_v8, %v733_v54  ;;  %v521_v28 = vadd.f32 %v2393_v41, %v505_v42  ;;  %v558_v25 = vmul.f32 %v2419_v12, %v857_v10  ;;  %v878_v55 = vmul.f32 %v2448_v5, %v858_v1 }
 0x159   :  { %1714 = vtanh.f32 %v1040_v32  ;;  %v1009_v31 = vmul.f32 0.044715, %v993_v4  ;;  %v2463_v43 = vadd.f32 %v930_v52, %v893_v50  ;;  %v611_v60 = vmul.f32 %v2402_v45, %v910_v33  ;;  %v806_v33 = vld [vmem:[#allocation2 + $0x120] sm:$0xff] }
 0x15a   :  { %v841_v63 = vadd.f32 %v825_v3, %v786_v0  ;;  %v574_v2 = vadd.f32 %v558_v25, %v521_v28  ;;  %v665_v38 = vmul.f32 %v2155_v34, %v805_v14  ;;  %v506_v9 = vmul.f32 %v2412_v61, %v805_v14  ;;  %v913_v28 = vld [vmem:[#allocation2 + $0x132] sm:$0xff] }
 0x15b   :  { %v1025_v51 = vadd.f32 %v1009_v31, %v2442_v36  ;;  %v978_v24 = vmul.f32 %v2463_v43, %v2463_v43  ;;  %v959_v47 = vmul.f32 0.5, %v2397_v37  ;;  %v931_v13 = vmul.f32 %v2192_v15, %v911_v23 }
 0x15c   :  { %v894_v29 = vadd.f32 %v878_v55, %v841_v63  ;;  %v627_v49 = vadd.f32 %v611_v60, %v574_v2  ;;  %v522_v44 = vadd.f32 %v2393_v41, %v506_v9  ;;  %v559_v10 = vmul.f32 %v2419_v12, %v858_v1  ;;  %v859_v12 = vld [vmem:[#allocation2 + $0x121] sm:$0xff] }
 0x15d   :  { %v1713_v6 = vpop.eup %1712  ;;  %v1041_v7 = vmul.f32 0.7978846, %v1025_v51  ;;  %v994_v11 = vmul.f32 %v978_v24, %v2463_v43  ;;  %v718_v61 = vmul.f32 %v2170_v53, %v858_v1  ;;  %v612_v20 = vmul.f32 %v2402_v45, %v911_v23  ;;  %v912_v45 = vld [vmem:[#allocation2 + $0x122] sm:$0xff]  ;;  %v860_v1 = vld [vmem:[#allocation2 + $0x131] sm:$0xff] }
 0x15e   :  { %v1071_v26 = vadd.f32 1.0, %v1713_v6  ;;  %v2477_v18 = vadd.f32 %v931_v13, %v894_v29  ;;  %v681_v17 = vadd.f32 %v665_v38, %v627_v49  ;;  %v575_v22 = vadd.f32 %v559_v10, %v522_v44 }
 0x15f   :  { %1716 = vtanh.f32 %v1041_v7  ;;  %v1010_v37 = vmul.f32 0.044715, %v994_v11  ;;  %v771_v41 = vmul.f32 %v2181_v57, %v911_v23  ;;  %v666_v62 = vmul.f32 %v2155_v34, %v806_v33 }
 0x160   :  { %v1087_v27 = vmul.f32 %v1071_v26, %v959_v47  ;;  %v979_v56 = vmul.f32 %v2477_v18, %v2477_v18  ;;  %v734_v35 = vadd.f32 %v718_v61, %v681_v17  ;;  %v628_v59 = vadd.f32 %v612_v20, %v575_v22 }
 0x161   :  { %v1026_v39 = vadd.f32 %v1010_v37, %v2463_v43  ;;  %v826_v21 = vmul.f32 %v2444_v58, %v806_v33  ;;  %v719_v8 = vmul.f32 %v2170_v53, %v859_v12  ;;  %v879_v54 = vmul.f32 %v2448_v5, %v859_v12  ;;  %v2503_v12 = vld [vmem:[%s2615_s6] ss:$0 sm:$0xff] }
 0x162   :  { %1612 = vmatmul.mubr.f32.gmra.mxu1 %v1087_v27  ;;  %v995_v48 = vmul.f32 %v979_v56, %v2477_v18  ;;  %v787_v14 = vadd.f32 %v771_v41, %v734_v35  ;;  %v682_v40 = vadd.f32 %v666_v62, %v628_v59  ;;  %v960_v4 = vmul.f32 0.5, %v2427_v46  ;;  %v1764_v62 = vld [vmem:[%s2609_s0 + $0x8] sm:$0xff] }
 0x163   :  { %v1042_v16 = vmul.f32 0.7978846, %v1026_v39  ;;  %v772_v50 = vmul.f32 %v2181_v57, %v912_v45  ;;  %v932_v0 = vmul.f32 %v2192_v15, %v912_v45  ;;  %v880_v25 = vmul.f32 %v2448_v5, %v860_v1  ;;  %v1765_v45 = vld [vmem:[%s2609_s0] sm:$0xff] }
 0x164   :  { %v1011_v19 = vmul.f32 0.044715, %v995_v48  ;;  %v842_v32 = vadd.f32 %v826_v21, %v787_v14  ;;  %v735_v34 = vadd.f32 %v719_v8, %v682_v40  ;;  %v933_v46 = vmul.f32 %v2192_v15, %v913_v28 }
 0x165   :  { %1718 = vtanh.f32 %v1042_v16  ;;  %v961_v51 = vmul.f32 0.5, %v2442_v36  ;;  %v962_v15 = vmul.f32 0.5, %v2463_v43  ;;  %v963_v17 = vmul.f32 0.5, %v2477_v18 }
 0x166   :  { %v1715_v42 = vpop.eup %1714  ;;  %v1027_v58 = vadd.f32 %v1011_v19, %v2477_v18  ;;  %v895_v3 = vadd.f32 %v879_v54, %v842_v32  ;;  %v788_v53 = vadd.f32 %v772_v50, %v735_v34 }
 0x167   :  { %v1072_v52 = vadd.f32 1.0, %v1715_v42 }
 0x168   :  { %v1043_v55 = vmul.f32 0.7978846, %v1027_v58  ;;  %v948_v23 = vadd.f32 %v932_v0, %v895_v3  ;;  %v843_v63 = vadd.f32 %v2047_v30, %v788_v53  ;;  %v1766_v3 = vld [vmem:[%s2609_s0 + $0x18] sm:$0xff] }
 0x169   :  { %v1088_v31 = vmul.f32 %v1072_v52, %v960_v4 }
 0x16a   :  { %1720 = vtanh.f32 %v1043_v55  ;;  %v980_v57 = vmul.f32 %v948_v23, %v948_v23  ;;  %v896_v2 = vadd.f32 %v880_v25, %v843_v63  ;;  %v964_v22 = vmul.f32 0.5, %v948_v23  ;;  %v1767_v25 = vld [vmem:[%s2609_s0 + $0x10] sm:$0xff] }
 0x16b   :  { %1614 = vmatprep.mubr.f32.mxu1 %v1088_v31 }
 0x16c   :  { %v1717_v60 = vpop.eup %1716  ;;  %v996_v38 = vmul.f32 %v980_v57, %v948_v23  ;;  %v949_v9 = vadd.f32 %v933_v46, %v896_v2 }
 0x16d   :  { %v1073_v24 = vadd.f32 1.0, %v1717_v60 }
 0x16e   :  { %v1012_v47 = vmul.f32 0.044715, %v996_v38  ;;  %v981_v5 = vmul.f32 %v949_v9, %v949_v9  ;;  %v965_v43 = vmul.f32 0.5, %v949_v9 }
 0x16f   :  { %v1089_v29 = vmul.f32 %v1073_v24, %v961_v51 }
 0x170   :  { %v1028_v13 = vadd.f32 %v1012_v47, %v948_v23  ;;  %v997_v49 = vmul.f32 %v981_v5, %v949_v9 }
 0x171   :  { %1615 = vmatmul.mubr.f32.gmra.mxu1 %v1089_v29 }
 0x172   :  { %v1719_v6 = vpop.eup %1718  ;;  %v1044_v30 = vmul.f32 0.7978846, %v1028_v13  ;;  %v1013_v11 = vmul.f32 0.044715, %v997_v49 }
 0x173   :  { %v1074_v7 = vadd.f32 1.0, %v1719_v6 }
 0x174   :  { %1722 = vtanh.f32 %v1044_v30  ;;  %v1029_v10 = vadd.f32 %v1013_v11, %v949_v9  ;;  %v1768_v11 = vld [vmem:[%s2609_s0 + $0x28] sm:$0xff] }
 0x175   :  { %v1090_v44 = vmul.f32 %v1074_v7, %v962_v15 }
 0x176   :  { %v1045_v36 = vmul.f32 0.7978846, %v1029_v10 }
 0x177   :  { %v1721_v26 = vpop.eup %1720  ;;  %1617 = vmatprep.mubr.f32.mxu1 %v1090_v44 }
 0x178   :  { %v1075_v61 = vadd.f32 1.0, %v1721_v26  ;;  %1724 = vtanh.f32 %v1045_v36  ;;  %v1769_v36 = vld [vmem:[%s2609_s0 + $0x20] sm:$0xff] }
 0x17a   :  { %v1091_v33 = vmul.f32 %v1075_v61, %v963_v17 }
 0x17c   :  { %1618 = vmatmul.mubr.f32.gmra.mxu1 %v1091_v33 }
 0x181   :  { %v1723_v37 = vpop.eup %1722 }
 0x182   :  { %v1076_v20 = vadd.f32 1.0, %v1723_v37 }
 0x184   :  { %v1092_v27 = vmul.f32 %v1076_v20, %v964_v22 }
 0x185   :  { %v1725_v56 = vpop.eup %1724 }
 0x186   :  { %1620 = vmatprep.mubr.f32.mxu1 %v1092_v27  ;;  %v1077_v35 = vadd.f32 1.0, %v1725_v56 }
 0x188   :  { %v1093_v41 = vmul.f32 %v1077_v35, %v965_v43 }
 0x18a   :  { %1621 = vmatmul.mubr.f32.gmra.mxu1 %v1093_v41 }
 0x1f1   :  { %v1601_v18 = vpop.f32.mrf.mxu0 }
 0x1f2   :  { %v1189_v39 = vadd.f32 %v1601_v18, %v2503_v12 }
 0x1f3   :  { %v1183_v59 = vpop.f32.mrf.mxu0 }
 0x1f4   :  { %v1263_v48 = vadd.f32 %v1764_v62, %v1189_v39  ;;  %v1184_v14 = vadd.f32 %v2503_v12, %v1183_v59  ;;  %v1770_v39 = vld [vmem:[%s2609_s0 + $0x38] sm:$0xff] }
 0x1f6   :  { %v1295_v21 = vmul.f32 %v1263_v48, %v1263_v48  ;;  %v1262_v16 = vadd.f32 %v1765_v45, %v1184_v14  ;;  %v1279_v9 = vmul.f32 0.5, %v1263_v48 }
 0x1f8   :  { %v1311_v40 = vmul.f32 %v1295_v21, %v1263_v48  ;;  %v1294_v8 = vmul.f32 %v1262_v16, %v1262_v16  ;;  %v1278_v13 = vmul.f32 0.5, %v1262_v16 }
 0x1fa   :  { %v1327_v19 = vmul.f32 0.044715, %v1311_v40  ;;  %v1310_v32 = vmul.f32 %v1294_v8, %v1262_v16 }
 0x1fc   :  { %v1343_v54 = vadd.f32 %v1327_v19, %v1263_v48  ;;  %v1326_v1 = vmul.f32 0.044715, %v1310_v32  ;;  %v1604_v42 = vpop.f32.mrf.mxu0  ;;  %v1771_v19 = vld [vmem:[%s2609_s0 + $0x30] sm:$0xff] }
 0x1fd   :  { %v1199_v50 = vadd.f32 %v1604_v42, %v2503_v12 }
 0x1fe   :  { %v1359_v4 = vmul.f32 0.7978846, %v1343_v54  ;;  %v1342_v34 = vadd.f32 %v1326_v1, %v1262_v16  ;;  %v1193_v52 = vpop.f32.mrf.mxu0 }
 0x1ff   :  { %v1265_v0 = vadd.f32 %v1766_v3, %v1199_v50  ;;  %v1194_v28 = vadd.f32 %v2503_v12, %v1193_v52 }
 0x200   :  { %1726 = vtanh.f32 %v1359_v4  ;;  %v1358_v58 = vmul.f32 0.7978846, %v1342_v34 }
 0x201   :  { %v1297_v53 = vmul.f32 %v1265_v0, %v1265_v0  ;;  %v1264_v31 = vadd.f32 %v1767_v25, %v1194_v28  ;;  %v1281_v27 = vmul.f32 0.5, %v1265_v0 }
 0x202   :  { %1728 = vtanh.f32 %v1358_v58 }
 0x203   :  { %v1313_v55 = vmul.f32 %v1297_v53, %v1265_v0  ;;  %v1296_v23 = vmul.f32 %v1264_v31, %v1264_v31  ;;  %v1280_v14 = vmul.f32 0.5, %v1264_v31 }
 0x205   :  { %v1329_v63 = vmul.f32 0.044715, %v1313_v55  ;;  %v1312_v46 = vmul.f32 %v1296_v23, %v1264_v31  ;;  %v1772_v55 = vld [vmem:[%s2609_s0 + $0x48] sm:$0xff] }
 0x207   :  { %v1345_v57 = vadd.f32 %v1329_v63, %v1265_v0  ;;  %v1328_v2 = vmul.f32 0.044715, %v1312_v46 }
 0x209   :  { %v1361_v60 = vmul.f32 0.7978846, %v1345_v57  ;;  %v1344_v38 = vadd.f32 %v1328_v2, %v1264_v31  ;;  %v1773_v2 = vld [vmem:[%s2609_s0 + $0x40] sm:$0xff] }
 0x20b   :  { %1730 = vtanh.f32 %v1361_v60  ;;  %v1360_v51 = vmul.f32 0.7978846, %v1344_v38 }
 0x20d   :  { %v1727_v24 = vpop.eup %1726  ;;  %1732 = vtanh.f32 %v1360_v51 }
 0x20e   :  { %v1391_v47 = vadd.f32 1.0, %v1727_v24 }
 0x20f   :  { %v1729_v29 = vpop.eup %1728 }
 0x210   :  { %v1407_v5 = vmul.f32 %v1391_v47, %v1279_v9  ;;  %v1390_v49 = vadd.f32 1.0, %v1729_v29 }
 0x212   :  { %1423 = vst.msk [vmem:[#allocation6 + $0x8] sm:$0xff] %vm68_vm0, %v1407_v5  ;;  %v1406_v6 = vmul.f32 %v1390_v49, %v1278_v13  ;;  %v1607_v30 = vpop.f32.mrf.mxu0 }
 0x213   :  { %v1209_v15 = vadd.f32 %v1607_v30, %v2503_v12 }
 0x214   :  { %1422 = vst.msk [vmem:[#allocation6] sm:$0xff] %vm68_vm0, %v1406_v6  ;;  %v1203_v7 = vpop.f32.mrf.mxu0 }
 0x215   :  { %v1267_v44 = vadd.f32 %v1768_v11, %v1209_v15  ;;  %v1204_v10 = vadd.f32 %v2503_v12, %v1203_v7 }
 0x217   :  { %v1299_v26 = vmul.f32 %v1267_v44, %v1267_v44  ;;  %v2531_v17 = vadd.f32 %v1769_v36, %v1204_v10  ;;  %v1610_v61 = vpop.f32.mrf.mxu1  ;;  %v1283_v13 = vmul.f32 0.5, %v1267_v44 }
 0x218   :  { %v1731_v33 = vpop.eup %1730  ;;  %v1219_v20 = vadd.f32 %v1610_v61, %v2503_v12 }
 0x219   :  { %v1315_v37 = vmul.f32 %v1299_v26, %v1267_v44  ;;  %v1298_v22 = vmul.f32 %v2531_v17, %v2531_v17  ;;  %v1393_v56 = vadd.f32 1.0, %v1731_v33  ;;  %v1213_v43 = vpop.f32.mrf.mxu1  ;;  %v1282_v11 = vmul.f32 0.5, %v2531_v17 }
 0x21a   :  { %v1733_v35 = vpop.eup %1732  ;;  %v2540_v59 = vadd.f32 %v1770_v39, %v1219_v20  ;;  %v1214_v62 = vadd.f32 %v2503_v12, %v1213_v43 }
 0x21b   :  { %v1331_v41 = vmul.f32 0.044715, %v1315_v37  ;;  %v1314_v18 = vmul.f32 %v1298_v22, %v2531_v17  ;;  %v1409_v48 = vmul.f32 %v1393_v56, %v1281_v27  ;;  %v1392_v21 = vadd.f32 1.0, %v1733_v35 }
 0x21c   :  { %v1301_v40 = vmul.f32 %v2540_v59, %v2540_v59  ;;  %v1268_v32 = vadd.f32 %v1771_v19, %v1214_v62  ;;  %v1285_v22 = vmul.f32 0.5, %v2540_v59 }
 0x21d   :  { %v1347_v45 = vadd.f32 %v1331_v41, %v1267_v44  ;;  %v1330_v16 = vmul.f32 0.044715, %v1314_v18  ;;  %1425 = vst.msk [vmem:[#allocation6 + $0x18] sm:$0xff] %vm68_vm0, %v1409_v48  ;;  %v1408_v8 = vmul.f32 %v1392_v21, %v1280_v14  ;;  %v1775_v18 = vld [vmem:[%s2609_s0 + $0x50] sm:$0xff] }
 0x21e   :  { %v1317_v42 = vmul.f32 %v1301_v40, %v2540_v59  ;;  %v1300_v4 = vmul.f32 %v1268_v32, %v1268_v32  ;;  %v1284_v62 = vmul.f32 0.5, %v1268_v32 }
 0x21f   :  { %v1363_v54 = vmul.f32 0.7978846, %v1347_v45  ;;  %v1346_v1 = vadd.f32 %v1330_v16, %v2531_v17  ;;  %1424 = vst.msk [vmem:[#allocation6 + $0x10] sm:$0xff] %vm68_vm0, %v1408_v8  ;;  %v1774_v17 = vld [vmem:[%s2609_s0 + $0x58] sm:$0xff] }
 0x220   :  { %v1333_v50 = vmul.f32 0.044715, %v1317_v42  ;;  %v1316_v52 = vmul.f32 %v1300_v4, %v1268_v32 }
 0x221   :  { %1734 = vtanh.f32 %v1363_v54  ;;  %v1362_v34 = vmul.f32 0.7978846, %v1346_v1 }
 0x222   :  { %v1349_v58 = vadd.f32 %v1333_v50, %v2540_v59  ;;  %v1613_v3 = vpop.f32.mrf.mxu1  ;;  %v1332_v0 = vmul.f32 0.044715, %v1316_v52  ;;  %v1776_v52 = vld [vmem:[%s2609_s0 + $0x68] sm:$0xff] }
 0x223   :  { %1736 = vtanh.f32 %v1362_v34  ;;  %v1229_v28 = vadd.f32 %v1613_v3, %v2503_v12 }
 0x224   :  { %v1365_v53 = vmul.f32 0.7978846, %v1349_v58  ;;  %v1223_v25 = vpop.f32.mrf.mxu1  ;;  %v1348_v31 = vadd.f32 %v1332_v0, %v1268_v32 }
 0x225   :  { %v1271_v23 = vadd.f32 %v1772_v55, %v1229_v28  ;;  %v1224_v63 = vadd.f32 %v2503_v12, %v1223_v25 }
 0x226   :  { %1738 = vtanh.f32 %v1365_v53  ;;  %v1364_v46 = vmul.f32 0.7978846, %v1348_v31 }
 0x227   :  { %v1303_v57 = vmul.f32 %v1271_v23, %v1271_v23  ;;  %v2561_v60 = vadd.f32 %v1773_v2, %v1224_v63  ;;  %v1287_v32 = vmul.f32 0.5, %v1271_v23 }
 0x228   :  { %1740 = vtanh.f32 %v1364_v46 }
 0x229   :  { %v1319_v38 = vmul.f32 %v1303_v57, %v1271_v23  ;;  %v1302_v51 = vmul.f32 %v2561_v60, %v2561_v60  ;;  %v1286_v25 = vmul.f32 0.5, %v2561_v60 }
 0x22b   :  { %v1335_v24 = vmul.f32 0.044715, %v1319_v38  ;;  %v1318_v9 = vmul.f32 %v1302_v51, %v2561_v60 }
 0x22d   :  { %v1351_v29 = vadd.f32 %v1335_v24, %v1271_v23  ;;  %v1334_v5 = vmul.f32 0.044715, %v1318_v9  ;;  %v1777_v23 = vld [vmem:[%s2609_s0 + $0x60] sm:$0xff] }
 0x22e   :  { %v1735_v47 = vpop.eup %1734 }
 0x22f   :  { %v1395_v49 = vadd.f32 1.0, %v1735_v47  ;;  %v1367_v30 = vmul.f32 0.7978846, %v1351_v29  ;;  %v1350_v15 = vadd.f32 %v1334_v5, %v2561_v60 }
 0x230   :  { %v1737_v6 = vpop.eup %1736 }
 0x231   :  { %v1411_v7 = vmul.f32 %v1395_v49, %v1283_v13  ;;  %v1394_v10 = vadd.f32 1.0, %v1737_v6  ;;  %1742 = vtanh.f32 %v1367_v30  ;;  %v1366_v26 = vmul.f32 0.7978846, %v1350_v15  ;;  %v1616_v36 = vpop.f32.mrf.mxu1 }
 0x232   :  { %v1239_v33 = vadd.f32 %v1616_v36, %v2503_v12 }
 0x233   :  { %1427 = vst.msk [vmem:[#allocation6 + $0x28] sm:$0xff] %vm68_vm0, %v1411_v7  ;;  %v1410_v61 = vmul.f32 %v1394_v10, %v1282_v11  ;;  %v1739_v37 = vpop.eup %1738  ;;  %1744 = vtanh.f32 %v1366_v26  ;;  %v1233_v44 = vpop.f32.mrf.mxu1  ;;  %v1778_v7 = vld [vmem:[%s2609_s0 + $0x78] sm:$0xff] }
 0x234   :  { %v1397_v20 = vadd.f32 1.0, %v1739_v37  ;;  %v1273_v27 = vadd.f32 %v1774_v17, %v1239_v33  ;;  %v1234_v56 = vadd.f32 %v2503_v12, %v1233_v44  ;;  %v1779_v44 = vld [vmem:[%s2609_s0 + $0x70] sm:$0xff]  ;;  %s1828_s0 = smov [#allocation6]  }
 0x235   :  { %1426 = vst.msk [vmem:[#allocation6 + $0x20] sm:$0xff] %vm68_vm0, %v1410_v61  ;;  %v1741_v43 = vpop.eup %1740  ;;  %s1443_s13 = sshll.u32 %s1828_s0, 4  ;;  %s1444_s13 = int_to_ptr.vmem [resolvable:$true] %s1443_s13 }
 0x236   :  { %v1413_v35 = vmul.f32 %v1397_v20, %v1285_v22  ;;  %v1305_v41 = vmul.f32 %v1273_v27, %v1273_v27  ;;  %v1272_v39 = vadd.f32 %v1775_v18, %v1234_v56  ;;  %v1396_v48 = vadd.f32 1.0, %v1741_v43  ;;  %s1800_s6 = scalar_lea.vmem %s1444_s13, 2048  ;;  %p1805_p6 = scmp.lt.s32.totalorder %s1444_s13, %s1444_s13 }
 0x237   :  { %v1289_v6 = vmul.f32 0.5, %v1273_v27  ;;  %p1801_p5 = scmp.ne.s32.totalorder %s1444_s13, %s1800_s6  ;;  %p1806_p7 = scmp.lt.s32.totalorder %s1800_s6, %s1800_s6 }
 0x238   :  { %1429 = vst.msk [vmem:[#allocation6 + $0x38] sm:$0xff] %vm68_vm0, %v1413_v35  ;;  %v1321_v59 = vmul.f32 %v1305_v41, %v1273_v27  ;;  %v1304_v14 = vmul.f32 %v1272_v39, %v1272_v39  ;;  %v1412_v21 = vmul.f32 %v1396_v48, %v1284_v62  ;;  %v1288_v61 = vmul.f32 0.5, %v1272_v39 }
 0x239   :  { %p1807_p8 = por %p1806_p7, %p1805_p6 }
 0x23a   :  { %v1337_v45 = vmul.f32 0.044715, %v1321_v59  ;;  %v1320_v16 = vmul.f32 %v1304_v14, %v1272_v39  ;;  %1428 = vst.msk [vmem:[#allocation6 + $0x30] sm:$0xff] %vm68_vm0, %v1412_v21 }
 0x23b   :  { %p1808_p9 = pnand %p1807_p8, %p1801_p5 }
 0x23c   :  { %v1353_v40 = vadd.f32 %v1337_v45, %v1273_v27  ;;  %v1336_v8 = vmul.f32 0.044715, %v1320_v16  ;;  %v1619_v19 = vpop.f32.mrf.mxu1 }
 0x23d   :  { %v1249_v54 = vadd.f32 %v1619_v19, %v2503_v12 }
 0x23e   :  { %v1743_v1 = vpop.eup %1742  ;;  %v1369_v42 = vmul.f32 0.7978846, %v1353_v40  ;;  %v1352_v4 = vadd.f32 %v1336_v8, %v1272_v39  ;;  %v1243_v34 = vpop.f32.mrf.mxu1 }
 0x23f   :  { %v1399_v50 = vadd.f32 1.0, %v1743_v1  ;;  %v1275_v58 = vadd.f32 %v1776_v52, %v1249_v54  ;;  %v1244_v3 = vadd.f32 %v2503_v12, %v1243_v34 }
 0x240   :  { %v1745_v0 = vpop.eup %1744  ;;  %1746 = vtanh.f32 %v1369_v42  ;;  %v1368_v28 = vmul.f32 0.7978846, %v1352_v4 }
 0x241   :  { %v1415_v53 = vmul.f32 %v1399_v50, %v1287_v32  ;;  %v1398_v31 = vadd.f32 1.0, %v1745_v0  ;;  %v1307_v55 = vmul.f32 %v1275_v58, %v1275_v58  ;;  %v1274_v63 = vadd.f32 %v1777_v23, %v1244_v3 }
 0x242   :  { %1748 = vtanh.f32 %v1368_v28  ;;  %v1291_v39 = vmul.f32 0.5, %v1275_v58 }
 0x243   :  { %1431 = vst.msk [vmem:[#allocation6 + $0x48] sm:$0xff] %vm68_vm0, %v1415_v53  ;;  %v1414_v46 = vmul.f32 %v1398_v31, %v1286_v25  ;;  %v1323_v57 = vmul.f32 %v1307_v55, %v1275_v58  ;;  %v1306_v2 = vmul.f32 %v1274_v63, %v1274_v63  ;;  %v1290_v45 = vmul.f32 0.5, %v1274_v63 }
 0x245   :  { %1430 = vst.msk [vmem:[#allocation6 + $0x40] sm:$0xff] %vm68_vm0, %v1414_v46  ;;  %v1339_v38 = vmul.f32 0.044715, %v1323_v57  ;;  %v1322_v51 = vmul.f32 %v1306_v2, %v1274_v63 }
 0x247   :  { %v1355_v24 = vadd.f32 %v1339_v38, %v1275_v58  ;;  %v1338_v9 = vmul.f32 0.044715, %v1322_v51 }
 0x249   :  { %v1371_v60 = vmul.f32 0.7978846, %v1355_v24  ;;  %v1354_v47 = vadd.f32 %v1338_v9, %v1274_v63 }
 0x24a   :  { %v1622_v29 = vpop.f32.mrf.mxu1 }
 0x24b   :  { %1750 = vtanh.f32 %v1371_v60  ;;  %v1370_v5 = vmul.f32 0.7978846, %v1354_v47  ;;  %v1259_v13 = vadd.f32 %v1622_v29, %v2503_v12 }
 0x24c   :  { %v1253_v30 = vpop.f32.mrf.mxu1 }
 0x24d   :  { %v1747_v49 = vpop.eup %1746  ;;  %1752 = vtanh.f32 %v1370_v5  ;;  %v1277_v11 = vadd.f32 %v1778_v7, %v1259_v13  ;;  %v1254_v10 = vadd.f32 %v2503_v12, %v1253_v30 }
 0x24e   :  { %v1401_v15 = vadd.f32 1.0, %v1747_v49 }
 0x24f   :  { %v1749_v26 = vpop.eup %1748  ;;  %v1309_v37 = vmul.f32 %v1277_v11, %v1277_v11  ;;  %v1276_v22 = vadd.f32 %v1779_v44, %v1254_v10  ;;  %v1293_v19 = vmul.f32 0.5, %v1277_v11 }
 0x250   :  { %v1417_v36 = vmul.f32 %v1401_v15, %v1289_v6  ;;  %v1400_v33 = vadd.f32 1.0, %v1749_v26 }
 0x251   :  { %v1325_v17 = vmul.f32 %v1309_v37, %v1277_v11  ;;  %v1308_v27 = vmul.f32 %v1276_v22, %v1276_v22  ;;  %v1292_v4 = vmul.f32 0.5, %v1276_v22 }
 0x252   :  { %1433 = vst.msk [vmem:[#allocation6 + $0x58] sm:$0xff] %vm68_vm0, %v1417_v36  ;;  %v1416_v20 = vmul.f32 %v1400_v33, %v1288_v61 }
 0x253   :  { %v1341_v56 = vmul.f32 0.044715, %v1325_v17  ;;  %v1324_v43 = vmul.f32 %v1308_v27, %v1276_v22 }
 0x254   :  { %1432 = vst.msk [vmem:[#allocation6 + $0x50] sm:$0xff] %vm68_vm0, %v1416_v20 }
 0x255   :  { %v1357_v12 = vadd.f32 %v1341_v56, %v1277_v11  ;;  %v1340_v35 = vmul.f32 0.044715, %v1324_v43 }
 0x257   :  { %v1373_v18 = vmul.f32 0.7978846, %v1357_v12  ;;  %v1356_v48 = vadd.f32 %v1340_v35, %v1276_v22 }
 0x258   :  { %v1751_v41 = vpop.eup %1750 }
 0x259   :  { %v1403_v62 = vadd.f32 1.0, %v1751_v41  ;;  %1754 = vtanh.f32 %v1373_v18  ;;  %v1372_v21 = vmul.f32 0.7978846, %v1356_v48 }
 0x25a   :  { %v1753_v59 = vpop.eup %1752 }
 0x25b   :  { %v1419_v14 = vmul.f32 %v1403_v62, %v1291_v39  ;;  %v1402_v16 = vadd.f32 1.0, %v1753_v59  ;;  %1756 = vtanh.f32 %v1372_v21 }
 0x25d   :  { %1435 = vst.msk [vmem:[#allocation6 + $0x68] sm:$0xff] %vm68_vm0, %v1419_v14  ;;  %v1418_v40 = vmul.f32 %v1402_v16, %v1290_v45 }
 0x25f   :  { %1434 = vst.msk [vmem:[#allocation6 + $0x60] sm:$0xff] %vm68_vm0, %v1418_v40 }
 0x266   :  { %v1755_v8 = vpop.eup %1754 }
 0x267   :  { %v1405_v54 = vadd.f32 1.0, %v1755_v8 }
 0x268   :  { %v1757_v1 = vpop.eup %1756 }
 0x269   :  { %v1421_v42 = vmul.f32 %v1405_v54, %v1293_v19  ;;  %v1404_v34 = vadd.f32 1.0, %v1757_v1 }
 0x26b   :  { %1437 = vst.msk [vmem:[#allocation6 + $0x78] sm:$0xff] %vm68_vm0, %v1421_v42  ;;  %v1420_v32 = vmul.f32 %v1404_v34, %v1292_v4 }
 0x26d   :  { %1436 = vst.msk [vmem:[#allocation6 + $0x70] sm:$0xff] %vm68_vm0, %v1420_v32 }
 0x26e   :  { %1811 = shalt.err (!%p1808_p9)
}
 0x26f   :  { %s1829_s14 = smov 128   ;;  %s1830_s15 = smov 8  }
 0x270   :  { %1449 = dma.vmem_to_hbm [thread:$0]  %s1444_s13, 2048, %s2616_s7, [#allocation5], %s1829_s14, %s1829_s14, %s1830_s15  }
 0x271   :  { %1822 = dma.done.wait [#allocation5], 2048  }
 0x272   :  { %1823 = vsyncadd [#allocation5], 4294965248 }
 0x273   :  { %1453 = vsyncpa [#allocation4], 1 }
 0x274   :  { %1454 = vsyncpa [#allocation5], 1 }

</bundles_post_ra>
